<compile_context>
chip_gen: v6e
topology: v6e:2x2x1
jax: 0.10.0
libtpu: 0.0.40
codegen_flags: <defaults>
</compile_context>

<pallas_src>
import functools

import jax
import jax.numpy as jnp
from jax.experimental import pallas as pl
from jax.experimental.pallas import tpu as pltpu

LANE = 128       # pad feature dims to multiples of the lane width
TILE_M = 512     # dst-node tile (output rows); bigger => fewer feature re-streams
TILE_K = 256     # src-node tile (reduction axis of A @ msg)


def _round_up(v, m):
    return ((v + m - 1) // m) * m


def _pad2d(a, rows, cols):
    return jnp.pad(a, ((0, rows - a.shape[0]), (0, cols - a.shape[1])))


def gcn_layer_kernel(flags_ref, remap_ref, alpha_ref, adj_ref, msg_ref,
                     xdst_ref, inorm_ref, wfc_ref, bfc_ref, wres_ref,
                     gamma_ref, beta_ref, out_ref, acc_ref,
                     *, fused_fc: bool, apply_norm_act: bool, f_out: int,
                     nk: int, eps: float = 1e-5):
    """One GraphConv layer; grid = (dst tile i, src tile k)."""
    i = pl.program_id(0)
    k = pl.program_id(1)

    @pl.when(k == 0)
    def _():
        acc_ref[...] = jnp.zeros_like(acc_ref)

    # Message passing on the MXU: acc += A_tile @ msg_tile (bf16 x bf16 -> f32).
    # Empty adjacency tiles skip the compute here; the DMA is skipped because
    # their index_map points back at the previously fetched (nonzero) tile.
    @pl.when(flags_ref[i * nk + k] != 0)
    def _():
        acc_ref[...] += jnp.dot(adj_ref[...], msg_ref[...],
                                preferred_element_type=jnp.float32)

    @pl.when(k == nk - 1)
    def _():
        agg = acc_ref[...]                                   # [TM, Fagg_pad]
        if fused_fc:
            # aggregate-then-transform: rst = (A @ h) @ W_fc (bf16 MXU, f32 acc)
            rst = jnp.dot(agg.astype(jnp.bfloat16), wfc_ref[...],
                          preferred_element_type=jnp.float32)
        else:
            # transform-then-aggregate: fc already applied to the messages.
            rst = agg
        # bias is added before the in-degree scaling, as in the reference.
        rst = (rst + bfc_ref[...]) * inorm_ref[...]
        # Residual fc (no bias) on the raw dst features.
        res = jnp.dot(xdst_ref[...], wres_ref[...],
                      preferred_element_type=jnp.float32)
        y = rst + res                                        # [TM, Fout_pad]
        if apply_norm_act:
            f_pad = y.shape[-1]
            inv_f = 1.0 / float(f_out)
            if f_out == f_pad:
                mean = jnp.sum(y, axis=-1, keepdims=True) * inv_f
                cen = y - mean
            else:
                col = jax.lax.broadcasted_iota(jnp.int32, y.shape, 1)
                mask = (col < f_out).astype(jnp.float32)
                mean = jnp.sum(y * mask, axis=-1, keepdims=True) * inv_f
                cen = (y - mean) * mask
            var = jnp.sum(cen * cen, axis=-1, keepdims=True) * inv_f
            y = cen * jax.lax.rsqrt(var + eps)
            y = y * gamma_ref[...] + beta_ref[...]
            alpha = alpha_ref[0, 0]                          # PReLU (shared)
            y = jnp.where(y >= 0.0, y, alpha * y)
        out_ref[...] = y.astype(out_ref.dtype)


def gcn_layer(adj, flags, remap, msg, xdst, in_norm, wfc, bfc, wres,
              gamma, beta, alpha, *, fused_fc, apply_norm_act, f_out,
              tile_m, tile_k, out_dtype):
    n_pad = adj.shape[0]
    fagg_pad = msg.shape[1]
    fin_pad = xdst.shape[1]
    fout_pad = wres.shape[1]
    ni, nk = n_pad // tile_m, n_pad // tile_k

    kernel = functools.partial(
        gcn_layer_kernel, fused_fc=fused_fc, apply_norm_act=apply_norm_act,
        f_out=f_out, nk=nk)

    single = pl.Buffered(1)   # grid-invariant operands: no double-buffering
    in_specs = [
        pl.BlockSpec(memory_space=pltpu.MemorySpace.SMEM),               # alpha
        pl.BlockSpec((tile_m, tile_k),
                     lambda i, k, flg, rmp: (i, rmp[i * nk + k])),       # A tile
        pl.BlockSpec((tile_k, fagg_pad),
                     lambda i, k, flg, rmp: (rmp[i * nk + k], 0)),       # messages
        pl.BlockSpec((tile_m, fin_pad), lambda i, k, flg, rmp: (i, 0)),  # x (dst)
        pl.BlockSpec((tile_m, 1), lambda i, k, flg, rmp: (i, 0)),        # in_norm
        pl.BlockSpec(wfc.shape, lambda i, k, flg, rmp: (0, 0),
                     pipeline_mode=single),                              # W_fc^T
        pl.BlockSpec((1, fout_pad), lambda i, k, flg, rmp: (0, 0),
                     pipeline_mode=single),                              # b_fc
        pl.BlockSpec((fin_pad, fout_pad), lambda i, k, flg, rmp: (0, 0),
                     pipeline_mode=single),                              # W_res^T
        pl.BlockSpec((1, fout_pad), lambda i, k, flg, rmp: (0, 0),
                     pipeline_mode=single),                              # gamma
        pl.BlockSpec((1, fout_pad), lambda i, k, flg, rmp: (0, 0),
                     pipeline_mode=single),                              # beta
    ]

    # VMEM budget from the actual block footprint (+ headroom), so moderate
    # hidden dims don't trip the 16/32 MiB scoped defaults.
    out_bytes = jnp.dtype(out_dtype).itemsize
    est = (3 * tile_m * tile_k * 2            # adjacency tiles
           + 2 * tile_k * fagg_pad * 2        # message tiles
           + 2 * tile_m * fin_pad * 2         # dst feature tiles
           + 2 * tile_m * 4                   # in_norm
           + wfc.size * 2 + wres.size * 2     # single-buffered bf16 weights
           + 3 * fout_pad * 4                 # bias / gamma / beta
           + 2 * tile_m * fout_pad * out_bytes
           + tile_m * fagg_pad * 4)           # f32 accumulator
    vmem_limit = int(min(max(2 * est + (8 << 20), 32 << 20), 56 << 20))

    grid_spec = pltpu.PrefetchScalarGridSpec(
        num_scalar_prefetch=2,
        grid=(ni, nk),
        in_specs=in_specs,
        out_specs=pl.BlockSpec((tile_m, fout_pad),
                               lambda i, k, flg, rmp: (i, 0)),
        scratch_shapes=[pltpu.VMEM((tile_m, fagg_pad), jnp.float32)],
    )
    return pl.pallas_call(
        kernel,
        out_shape=jax.ShapeDtypeStruct((n_pad, fout_pad), out_dtype),
        grid_spec=grid_spec,
        compiler_params=pltpu.CompilerParams(
            dimension_semantics=("parallel", "arbitrary"),
            vmem_limit_bytes=vmem_limit),
    )(flags, remap, alpha, adj, msg, xdst, in_norm, wfc, bfc, wres,
      gamma, beta)


def gcn_forward(adj, feats, params, *, tile_m=TILE_M, tile_k=TILE_K):
    n = adj.shape[0]
    adj = adj.astype(jnp.float32)

    # Degree-based symmetric normalization vectors (graph preprocessing, f32).
    in_deg = jnp.sum(adj, axis=1).reshape(-1, 1)      # dst in-degree  [N,1]
    out_deg = jnp.sum(adj, axis=0).reshape(-1, 1)     # src out-degree [N,1]
    in_norm = jax.lax.rsqrt(jnp.maximum(in_deg, 1.0))
    out_norm = jax.lax.rsqrt(jnp.maximum(out_deg, 1.0))

    # Padding policy: pad N only to a lane-friendly multiple and shrink the
    # tiles for small graphs instead of padding up to the default tile size.
    n128 = _round_up(n, LANE)
    if n128 <= tile_k:
        n_pad = n128
        tk = tm = n_pad
    else:
        tk = tile_k
        n_pad = _round_up(n, tk)
        tm = tile_m if n_pad % tile_m == 0 else tk

    adj_p = _pad2d(adj, n_pad, n_pad)
    ni, nk = n_pad // tm, n_pad // tk

    # Tile-level sparsity map: flags[i,k] = tile (i,k) has any edge;
    # remap[i,k] = last nonzero src-tile index <= k (empty tiles point at the
    # previously fetched block, so the pipeline skips their DMA).
    blk = adj_p.reshape(ni, tm, nk, tk)
    flags2 = jnp.any(blk != 0, axis=(1, 3))
    kk = jnp.broadcast_to(jnp.arange(nk, dtype=jnp.int32)[None, :], (ni, nk))
    remap2 = jax.lax.cummax(jnp.where(flags2, kk, -1), axis=1)
    flags = flags2.astype(jnp.int32).reshape(-1)
    remap = jnp.maximum(remap2, 0).astype(jnp.int32).reshape(-1)

    adj_bf = adj_p.astype(jnp.bfloat16)               # 0/1 is exact in bf16
    in_norm_p = _pad2d(in_norm, n_pad, 1)
    out_norm_p = _pad2d(out_norm, n_pad, 1)

    fin0_pad = _round_up(feats.shape[1], LANE)
    h = _pad2d(feats.astype(jnp.float32), n_pad, fin0_pad).astype(jnp.bfloat16)

    n_layers = len(params)
    for li, p in enumerate(params):
        d_in, d_out = p["wfc_t"].shape
        fin_pad = _round_up(d_in, LANE)
        fout_pad = _round_up(d_out, LANE)
        assert h.shape == (n_pad, fin_pad)

        wfc_bf = _pad2d(p["wfc_t"], fin_pad, fout_pad).astype(jnp.bfloat16)
        wres_bf = _pad2d(p["wres_t"], fin_pad, fout_pad).astype(jnp.bfloat16)
        bfc = _pad2d(p["bfc"].reshape(1, -1), 1, fout_pad)
        gamma = _pad2d(p["gamma"].reshape(1, -1), 1, fout_pad)
        beta = _pad2d(p["beta"].reshape(1, -1), 1, fout_pad)
        alpha = jnp.asarray(p["alpha"], jnp.float32).reshape(1, 1)

        # Source-side GCN normalization applied once per layer (not once per
        # dst tile); messages stream in bf16.
        h_scaled = (h.astype(jnp.float32) * out_norm_p).astype(jnp.bfloat16)

        fused_fc = fout_pad >= fin_pad
        if fused_fc:
            msg = h_scaled                                   # aggregate, then fc
            wfc_in = wfc_bf
        else:
            # Fout < Fin: cheaper to transform first, then aggregate the
            # narrower messages (bias is still added after aggregation).
            msg = jnp.dot(h_scaled, wfc_bf,
                          preferred_element_type=jnp.float32
                          ).astype(jnp.bfloat16)
            wfc_in = jnp.zeros((8, LANE), jnp.bfloat16)      # unused placeholder

        out_dtype = jnp.float32 if li == n_layers - 1 else jnp.bfloat16
        h = gcn_layer(adj_bf, flags, remap, msg, h, in_norm_p,
                      wfc_in, bfc, wres_bf, gamma, beta, alpha,
                      fused_fc=fused_fc, apply_norm_act=p["apply_norm_act"],
                      f_out=d_out, tile_m=tm, tile_k=tk, out_dtype=out_dtype)
        # F.dropout(h) between layers in eval mode == identity

    out_dim = params[-1]["wfc_t"].shape[1]
    return h[:n, :out_dim]


def init_linear(key, in_dim, out_dim, bias=True):
    # nn.Linear.reset_parameters: U(-1/sqrt(in_dim), 1/sqrt(in_dim))
    bound = 1.0 / jnp.sqrt(jnp.float32(in_dim))
    kw, kb = jax.random.split(key)
    w = jax.random.uniform(kw, (out_dim, in_dim), jnp.float32, -bound, bound)
    b = (jax.random.uniform(kb, (out_dim,), jnp.float32, -bound, bound)
         if bias else None)
    return w, b


def build_gcn_params(key, in_dim, num_hidden, out_dim, num_layers):
    """Per-layer parameter dicts (encoding=False semantics)."""
    dims = [in_dim] + [num_hidden] * (num_layers - 1) + [out_dim]
    params = []
    for li in range(num_layers):
        key, k1, k2 = jax.random.split(key, 3)
        d_in, d_out = dims[li], dims[li + 1]
        w_fc, b_fc = init_linear(k1, d_in, d_out, bias=True)
        w_res, _ = init_linear(k2, d_in, d_out, bias=False)
        last = li == num_layers - 1
        params.append({
            "wfc_t": w_fc.T,                            # [d_in, d_out]
            "bfc": b_fc,                                # [d_out]
            "wres_t": w_res.T,                          # [d_in, d_out]
            "gamma": jnp.ones((d_out,), jnp.float32),   # LayerNorm weight
            "beta": jnp.zeros((d_out,), jnp.float32),   # LayerNorm bias
            "alpha": jnp.float32(0.25),                 # PReLU init
            "apply_norm_act": not last,                 # last layer plain
        })
    return params


def gcn_reference(adj, feats, params):
    """Pure-JAX f32 reference of the same forward pass (validation only)."""
    adj = adj.astype(jnp.float32)
    in_norm = jax.lax.rsqrt(jnp.maximum(jnp.sum(adj, axis=1, keepdims=True), 1.0))
    out_norm = jax.lax.rsqrt(jnp.maximum(jnp.sum(adj, axis=0, keepdims=True), 1.0))
    h = feats.astype(jnp.float32)
    for p in params:
        agg = adj @ (h * out_norm.T)
        rst = (agg @ p["wfc_t"] + p["bfc"]) * in_norm
        y = rst + h @ p["wres_t"]
        if p["apply_norm_act"]:
            mean = jnp.mean(y, axis=-1, keepdims=True)
            var = jnp.mean((y - mean) ** 2, axis=-1, keepdims=True)
            y = (y - mean) * jax.lax.rsqrt(var + 1e-5)
            y = y * p["gamma"] + p["beta"]
            y = jnp.where(y >= 0.0, y, p["alpha"] * y)
        h = y
    return h


def _run_and_check(key, n, in_dim, num_hidden, out_dim, num_layers,
                   density, src_cutoff=None):
    k_graph, k_feat, k_param = jax.random.split(key, 3)
    adj = (jax.random.uniform(k_graph, (n, n)) < density).astype(jnp.float32)
    if src_cutoff is not None:
        # zero out edges from high-index sources -> whole src tiles are empty,
        # exercising the sparsity DMA/compute skip.
        adj = adj * (jnp.arange(n) < src_cutoff).astype(jnp.float32)[None, :]
    feats = jax.random.normal(k_feat, (n, in_dim), jnp.float32)
    params = build_gcn_params(k_param, in_dim, num_hidden, out_dim, num_layers)

    out = jax.block_until_ready(gcn_forward(adj, feats, params))
    assert out.shape == (n, out_dim), out.shape
    assert bool(jnp.all(jnp.isfinite(out)))

    # Loose tolerance: aggregation, weights and hidden activations run bf16.
    ref = gcn_reference(adj, feats, params)
    err = float(jnp.max(jnp.abs(out - ref)))
    scale = float(jnp.max(jnp.abs(ref))) + 1e-6
    assert err / scale < 0.12, f"relative error too large: {err / scale}"


if __name__ == "__main__":
    key = jax.random.PRNGKey(0)
    k1, k2 = jax.random.split(key)

    # Small graph: single 128x128 tile, all layers aggregate-then-transform.
    _run_and_check(k1, n=16, in_dim=8, num_hidden=32, out_dim=16,
                   num_layers=3, density=0.3)

    # Larger graph: padded to 512, 2 src tiles with the 2nd completely empty
    # (exercises the sparsity skip); last layer has Fout_pad < Fin_pad so it
    # takes the transform-then-aggregate path; hidden activations in bf16.
    _run_and_check(k2, n=300, in_dim=100, num_hidden=200, out_dim=24,
                   num_layers=3, density=0.25, src_cutoff=150)

    print("KERNEL_OK")
</pallas_src>

<mosaic_0001>
module attributes {stable_mosaic.version = 11 : i64} {
  func.func @gcn_layer_kernel(%arg0: i32, %arg1: i32, %arg2: memref<1xi32, #tpu.memory_space<smem>>, %arg3: memref<1xi32, #tpu.memory_space<smem>>, %arg4: memref<1x1xf32, #tpu.memory_space<smem>>, %arg5: memref<128x128xbf16, #tpu.memory_space<vmem>>, %arg6: memref<128x128xbf16, #tpu.memory_space<vmem>>, %arg7: memref<128x128xbf16, #tpu.memory_space<vmem>>, %arg8: memref<128x1xf32, #tpu.memory_space<vmem>>, %arg9: memref<128x128xbf16, #tpu.memory_space<vmem>>, %arg10: memref<1x128xf32, #tpu.memory_space<vmem>>, %arg11: memref<128x128xbf16, #tpu.memory_space<vmem>>, %arg12: memref<1x128xf32, #tpu.memory_space<vmem>>, %arg13: memref<1x128xf32, #tpu.memory_space<vmem>>, %arg14: memref<128x128xbf16, #tpu.memory_space<vmem>>, %arg15: memref<128x128xf32, #tpu.memory_space<vmem>>) attributes {dimension_semantics = [#tpu.dimension_semantics<parallel>, #tpu.dimension_semantics<arbitrary>], iteration_bounds = array<i64: 1, 1>, scalar_prefetch = 2 : i64, scratch_operands = 1 : i64, tpu.core_type = #tpu.core_type<tc>, window_params = [{transform_indices = @transform_0, window_bounds = array<i64: 1, 1>}, {transform_indices = @transform_1, window_bounds = array<i64: 128, 128>}, {transform_indices = @transform_2, window_bounds = array<i64: 128, 128>}, {transform_indices = @transform_3, window_bounds = array<i64: 128, 128>}, {transform_indices = @transform_4, window_bounds = array<i64: 128, 1>}, {pipeline_mode = #tpu.pipeline_mode<synchronous>, transform_indices = @transform_5, window_bounds = array<i64: 128, 128>}, {pipeline_mode = #tpu.pipeline_mode<synchronous>, transform_indices = @transform_6, window_bounds = array<i64: 1, 128>}, {pipeline_mode = #tpu.pipeline_mode<synchronous>, transform_indices = @transform_7, window_bounds = array<i64: 128, 128>}, {pipeline_mode = #tpu.pipeline_mode<synchronous>, transform_indices = @transform_8, window_bounds = array<i64: 1, 128>}, {pipeline_mode = #tpu.pipeline_mode<synchronous>, transform_indices = @transform_9, window_bounds = array<i64: 1, 128>}, {transform_indices = @transform_10, window_bounds = array<i64: 128, 128>}]} {
    %c0_i32 = arith.constant 0 : i32
    %0 = arith.cmpi eq, %arg1, %c0_i32 : i32
    %1 = arith.extui %0 : i1 to i32
    %c0_i32_0 = arith.constant 0 : i32
    %2 = arith.cmpi ne, %1, %c0_i32_0 : i32
    scf.if %2 {
      %cst = arith.constant 0.000000e+00 : f32
      %13 = vector.broadcast %cst : f32 to vector<128x128xf32>
      %c0 = arith.constant 0 : index
      %c0_5 = arith.constant 0 : index
      %14 = vector.load %arg15[%c0, %c0_5] : memref<128x128xf32, #tpu.memory_space<vmem>>, vector<128x128xf32>
      tpu.vector_store %arg15[%c0, %c0_5], %13 {strides = array<i32>} : memref<128x128xf32, #tpu.memory_space<vmem>>, vector<128x128xf32>,
    } else {
    }
    %c1_i32 = arith.constant 1 : i32
    %3 = arith.muli %arg0, %c1_i32 : i32
    %4 = arith.addi %3, %arg1 : i32
    %5 = arith.index_cast %4 : i32 to index
    %6 = memref.load %arg2[%5] : memref<1xi32, #tpu.memory_space<smem>>
    %c0_i32_1 = arith.constant 0 : i32
    %7 = arith.cmpi ne, %6, %c0_i32_1 : i32
    %8 = arith.extui %7 : i1 to i32
    %c0_i32_2 = arith.constant 0 : i32
    %9 = arith.cmpi ne, %8, %c0_i32_2 : i32
    scf.if %9 {
      %c0 = arith.constant 0 : index
      %c0_5 = arith.constant 0 : index
      %13 = vector.load %arg15[%c0, %c0_5] : memref<128x128xf32, #tpu.memory_space<vmem>>, vector<128x128xf32>
      %c0_6 = arith.constant 0 : index
      %c0_7 = arith.constant 0 : index
      %14 = vector.load %arg5[%c0_6, %c0_7] : memref<128x128xbf16, #tpu.memory_space<vmem>>, vector<128x128xbf16>
      %c0_8 = arith.constant 0 : index
      %c0_9 = arith.constant 0 : index
      %15 = vector.load %arg6[%c0_8, %c0_9] : memref<128x128xbf16, #tpu.memory_space<vmem>>, vector<128x128xbf16>
      %cst = arith.constant dense<0.000000e+00> : vector<128x128xf32>
      %16 = tpu.matmul %14, %15, %cst {dimension_numbers = #tpu.dot_dimension_numbers<[1], [0], [0], [1], [0, 0, 1, 1], [], []>} : vector<128x128xbf16>, vector<128x128xbf16>, vector<128x128xf32> -> vector<128x128xf32>
      %17 = arith.addf %13, %16 : vector<128x128xf32>
      %c0_10 = arith.constant 0 : index
      %c0_11 = arith.constant 0 : index
      %18 = vector.load %arg15[%c0_10, %c0_11] : memref<128x128xf32, #tpu.memory_space<vmem>>, vector<128x128xf32>
      tpu.vector_store %arg15[%c0_10, %c0_11], %17 {strides = array<i32>} : memref<128x128xf32, #tpu.memory_space<vmem>>, vector<128x128xf32>,
    } else {
    }
    %c0_i32_3 = arith.constant 0 : i32
    %10 = arith.cmpi eq, %arg1, %c0_i32_3 : i32
    %11 = arith.extui %10 : i1 to i32
    %c0_i32_4 = arith.constant 0 : i32
    %12 = arith.cmpi ne, %11, %c0_i32_4 : i32
    scf.if %12 {
      %c0 = arith.constant 0 : index
      %c0_5 = arith.constant 0 : index
      %13 = vector.load %arg15[%c0, %c0_5] : memref<128x128xf32, #tpu.memory_space<vmem>>, vector<128x128xf32>
      %14 = arith.truncf %13 : vector<128x128xf32> to vector<128x128xbf16>
      %c0_6 = arith.constant 0 : index
      %c0_7 = arith.constant 0 : index
      %15 = vector.load %arg9[%c0_6, %c0_7] : memref<128x128xbf16, #tpu.memory_space<vmem>>, vector<128x128xbf16>
      %cst = arith.constant dense<0.000000e+00> : vector<128x128xf32>
      %16 = tpu.matmul %14, %15, %cst {dimension_numbers = #tpu.dot_dimension_numbers<[1], [0], [0], [1], [0, 0, 1, 1], [], []>} : vector<128x128xbf16>, vector<128x128xbf16>, vector<128x128xf32> -> vector<128x128xf32>
      %c0_8 = arith.constant 0 : index
      %c0_9 = arith.constant 0 : index
      %17 = vector.load %arg10[%c0_8, %c0_9] : memref<1x128xf32, #tpu.memory_space<vmem>>, vector<1x128xf32>
      %18 = vector.broadcast %17 : vector<1x128xf32> to vector<128x128xf32>
      %19 = arith.addf %16, %18 : vector<128x128xf32>
      %c0_10 = arith.constant 0 : index
      %c0_11 = arith.constant 0 : index
      %20 = vector.load %arg8[%c0_10, %c0_11] : memref<128x1xf32, #tpu.memory_space<vmem>>, vector<128x1xf32>
      %21 = vector.broadcast %20 : vector<128x1xf32> to vector<128x128xf32>
      %22 = arith.mulf %19, %21 : vector<128x128xf32>
      %c0_12 = arith.constant 0 : index
      %c0_13 = arith.constant 0 : index
      %23 = vector.load %arg7[%c0_12, %c0_13] : memref<128x128xbf16, #tpu.memory_space<vmem>>, vector<128x128xbf16>
      %c0_14 = arith.constant 0 : index
      %c0_15 = arith.constant 0 : index
      %24 = vector.load %arg11[%c0_14, %c0_15] : memref<128x128xbf16, #tpu.memory_space<vmem>>, vector<128x128xbf16>
      %cst_16 = arith.constant dense<0.000000e+00> : vector<128x128xf32>
      %25 = tpu.matmul %23, %24, %cst_16 {dimension_numbers = #tpu.dot_dimension_numbers<[1], [0], [0], [1], [0, 0, 1, 1], [], []>} : vector<128x128xbf16>, vector<128x128xbf16>, vector<128x128xf32> -> vector<128x128xf32>
      %26 = arith.addf %22, %25 : vector<128x128xf32>
      %27 = tpu.iota {dimensions = array<i32: 1>} : vector<128x128xi32>
      %c32_i32 = arith.constant 32 : i32
      %28 = vector.broadcast %c32_i32 : i32 to vector<128x128xi32>
      %29 = arith.cmpi slt, %27, %28 : vector<128x128xi32>
      %30 = arith.extui %29 : vector<128x128xi1> to vector<128x128xi32>
      %31 = arith.sitofp %30 : vector<128x128xi32> to vector<128x128xf32>
      %32 = arith.mulf %26, %31 : vector<128x128xf32>
      %cst_17 = arith.constant dense<0.000000e+00> : vector<128xf32>
      %33 = vector.multi_reduction <add>, %32, %cst_17 [1] : vector<128x128xf32> to vector<128xf32>
      %34 = vector.shape_cast %33 : vector<128xf32> to vector<128x1xf32>
      %cst_18 = arith.constant 3.125000e-02 : f32
      %35 = vector.broadcast %cst_18 : f32 to vector<128x1xf32>
      %36 = arith.mulf %34, %35 : vector<128x1xf32>
      %37 = vector.broadcast %36 : vector<128x1xf32> to vector<128x128xf32>
      %38 = arith.subf %26, %37 : vector<128x128xf32>
      %39 = arith.mulf %38, %31 : vector<128x128xf32>
      %40 = arith.mulf %39, %39 : vector<128x128xf32>
      %cst_19 = arith.constant dense<0.000000e+00> : vector<128xf32>
      %41 = vector.multi_reduction <add>, %40, %cst_19 [1] : vector<128x128xf32> to vector<128xf32>
      %42 = vector.shape_cast %41 : vector<128xf32> to vector<128x1xf32>
      %cst_20 = arith.constant 3.125000e-02 : f32
      %43 = vector.broadcast %cst_20 : f32 to vector<128x1xf32>
      %44 = arith.mulf %42, %43 : vector<128x1xf32>
      %cst_21 = arith.constant 9.99999974E-6 : f32
      %45 = vector.broadcast %cst_21 : f32 to vector<128x1xf32>
      %46 = arith.addf %44, %45 : vector<128x1xf32>
      %47 = math.rsqrt %46 : vector<128x1xf32>
      %48 = vector.broadcast %47 : vector<128x1xf32> to vector<128x128xf32>
      %49 = arith.mulf %39, %48 : vector<128x128xf32>
      %c0_22 = arith.constant 0 : index
      %c0_23 = arith.constant 0 : index
      %50 = vector.load %arg12[%c0_22, %c0_23] : memref<1x128xf32, #tpu.memory_space<vmem>>, vector<1x128xf32>
      %51 = vector.broadcast %50 : vector<1x128xf32> to vector<128x128xf32>
      %52 = arith.mulf %49, %51 : vector<128x128xf32>
      %c0_24 = arith.constant 0 : index
      %c0_25 = arith.constant 0 : index
      %53 = vector.load %arg13[%c0_24, %c0_25] : memref<1x128xf32, #tpu.memory_space<vmem>>, vector<1x128xf32>
      %54 = vector.broadcast %53 : vector<1x128xf32> to vector<128x128xf32>
      %55 = arith.addf %52, %54 : vector<128x128xf32>
      %c0_26 = arith.constant 0 : index
      %c0_27 = arith.constant 0 : index
      %56 = memref.load %arg4[%c0_26, %c0_27] : memref<1x1xf32, #tpu.memory_space<smem>>
      %cst_28 = arith.constant 0.000000e+00 : f32
      %57 = vector.broadcast %cst_28 : f32 to vector<128x128xf32>
      %58 = arith.cmpf oge, %55, %57 : vector<128x128xf32>
      %59 = vector.broadcast %56 : f32 to vector<128x128xf32>
      %60 = arith.mulf %59, %55 : vector<128x128xf32>
      %61 = arith.select %58, %55, %60 : vector<128x128xi1>, vector<128x128xf32>
      %62 = arith.truncf %61 : vector<128x128xf32> to vector<128x128xbf16>
      %c0_29 = arith.constant 0 : index
      %c0_30 = arith.constant 0 : index
      %63 = vector.load %arg14[%c0_29, %c0_30] : memref<128x128xbf16, #tpu.memory_space<vmem>>, vector<128x128xbf16>
      tpu.vector_store %arg14[%c0_29, %c0_30], %62 {strides = array<i32>} : memref<128x128xbf16, #tpu.memory_space<vmem>>, vector<128x128xbf16>,
    } else {
    }
    return
  }
  func.func @transform_0(%arg0: i32, %arg1: i32, %arg2: memref<1xi32, #tpu.memory_space<smem>>, %arg3: memref<1xi32, #tpu.memory_space<smem>>) -> (i32, i32) {
    %c0_i32 = arith.constant 0 : i32
    %c0_i32_0 = arith.constant 0 : i32
    %c0_i32_1 = arith.constant 0 : i32
    return %c0_i32, %c0_i32_0 : i32, i32
  }
  func.func @transform_1(%arg0: i32, %arg1: i32, %arg2: memref<1xi32, #tpu.memory_space<smem>>, %arg3: memref<1xi32, #tpu.memory_space<smem>>) -> (i32, i32) {
    %c1_i32 = arith.constant 1 : i32
    %0 = arith.muli %arg0, %c1_i32 : i32
    %1 = arith.addi %0, %arg1 : i32
    %2 = arith.index_cast %1 : i32 to index
    %3 = memref.load %arg3[%2] : memref<1xi32, #tpu.memory_space<smem>>
    %c0_i32 = arith.constant 0 : i32
    return %arg0, %3 : i32, i32
  }
  func.func @transform_2(%arg0: i32, %arg1: i32, %arg2: memref<1xi32, #tpu.memory_space<smem>>, %arg3: memref<1xi32, #tpu.memory_space<smem>>) -> (i32, i32) {
    %c1_i32 = arith.constant 1 : i32
    %0 = arith.muli %arg0, %c1_i32 : i32
    %1 = arith.addi %0, %arg1 : i32
    %2 = arith.index_cast %1 : i32 to index
    %3 = memref.load %arg3[%2] : memref<1xi32, #tpu.memory_space<smem>>
    %c0_i32 = arith.constant 0 : i32
    %c0_i32_0 = arith.constant 0 : i32
    return %3, %c0_i32 : i32, i32
  }
  func.func @transform_3(%arg0: i32, %arg1: i32, %arg2: memref<1xi32, #tpu.memory_space<smem>>, %arg3: memref<1xi32, #tpu.memory_space<smem>>) -> (i32, i32) {
    %c0_i32 = arith.constant 0 : i32
    %c0_i32_0 = arith.constant 0 : i32
    return %arg0, %c0_i32 : i32, i32
  }
  func.func @transform_4(%arg0: i32, %arg1: i32, %arg2: memref<1xi32, #tpu.memory_space<smem>>, %arg3: memref<1xi32, #tpu.memory_space<smem>>) -> (i32, i32) {
    %c0_i32 = arith.constant 0 : i32
    %c0_i32_0 = arith.constant 0 : i32
    return %arg0, %c0_i32 : i32, i32
  }
  func.func @transform_5(%arg0: i32, %arg1: i32, %arg2: memref<1xi32, #tpu.memory_space<smem>>, %arg3: memref<1xi32, #tpu.memory_space<smem>>) -> (i32, i32) {
    %c0_i32 = arith.constant 0 : i32
    %c0_i32_0 = arith.constant 0 : i32
    %c0_i32_1 = arith.constant 0 : i32
    return %c0_i32, %c0_i32_0 : i32, i32
  }
  func.func @transform_6(%arg0: i32, %arg1: i32, %arg2: memref<1xi32, #tpu.memory_space<smem>>, %arg3: memref<1xi32, #tpu.memory_space<smem>>) -> (i32, i32) {
    %c0_i32 = arith.constant 0 : i32
    %c0_i32_0 = arith.constant 0 : i32
    %c0_i32_1 = arith.constant 0 : i32
    return %c0_i32, %c0_i32_0 : i32, i32
  }
  func.func @transform_7(%arg0: i32, %arg1: i32, %arg2: memref<1xi32, #tpu.memory_space<smem>>, %arg3: memref<1xi32, #tpu.memory_space<smem>>) -> (i32, i32) {
    %c0_i32 = arith.constant 0 : i32
    %c0_i32_0 = arith.constant 0 : i32
    %c0_i32_1 = arith.constant 0 : i32
    return %c0_i32, %c0_i32_0 : i32, i32
  }
  func.func @transform_8(%arg0: i32, %arg1: i32, %arg2: memref<1xi32, #tpu.memory_space<smem>>, %arg3: memref<1xi32, #tpu.memory_space<smem>>) -> (i32, i32) {
    %c0_i32 = arith.constant 0 : i32
    %c0_i32_0 = arith.constant 0 : i32
    %c0_i32_1 = arith.constant 0 : i32
    return %c0_i32, %c0_i32_0 : i32, i32
  }
  func.func @transform_9(%arg0: i32, %arg1: i32, %arg2: memref<1xi32, #tpu.memory_space<smem>>, %arg3: memref<1xi32, #tpu.memory_space<smem>>) -> (i32, i32) {
    %c0_i32 = arith.constant 0 : i32
    %c0_i32_0 = arith.constant 0 : i32
    %c0_i32_1 = arith.constant 0 : i32
    return %c0_i32, %c0_i32_0 : i32, i32
  }
  func.func @transform_10(%arg0: i32, %arg1: i32, %arg2: memref<1xi32, #tpu.memory_space<smem>>, %arg3: memref<1xi32, #tpu.memory_space<smem>>) -> (i32, i32) {
    %c0_i32 = arith.constant 0 : i32
    %c0_i32_0 = arith.constant 0 : i32
    return %arg0, %c0_i32 : i32, i32
  }
}

</mosaic_0001>

<bundles_post_ra>
// kernel: tpu_custom_call.1
= control target key start
LH: loop header
LB: loop body
LE: loop exit
PB: predicated region body
PF: predicated region fallthrough
CT: control target
= control target key end

     0   :  { %s2326_s0 = inlined_call_operand.<no memory space> [shape: s32[1], index: 0, kind: input, shape index: {}]   ;;  %s2327_s1 = inlined_call_operand.<no memory space> [shape: s32[1], index: 1, kind: input, shape index: {}]   ;;  %s2328_s2 = inlined_call_operand.<no memory space> [shape: f32[1,1], index: 2, kind: input, shape index: {}]   ;;  %s2329_s3 = inlined_call_operand.vmem [shape: bf16[128,128], index: 3, kind: input, shape index: {}]   ;;  %s2330_s4 = inlined_call_operand.vmem [shape: bf16[128,128], index: 4, kind: input, shape index: {}]   ;;  %s2331_s5 = inlined_call_operand.hbm [shape: bf16[128,128], index: 5, kind: input, shape index: {}]   ;;  %s2332_s6 = inlined_call_operand.vmem [shape: f32[128,1], index: 6, kind: input, shape index: {}]   ;;  %s2333_s7 = inlined_call_operand.hbm [shape: bf16[128,128], index: 7, kind: input, shape index: {}]   ;;  %s2334_s8 = inlined_call_operand.vmem [shape: f32[1,128], index: 8, kind: input, shape index: {}]   ;;  %s2335_s9 = inlined_call_operand.hbm [shape: bf16[128,128], index: 9, kind: input, shape index: {}]   ;;  %s2336_s10 = inlined_call_operand.vmem [shape: f32[1,128], index: 10, kind: input, shape index: {}]   ;;  %s2337_s11 = inlined_call_operand.vmem [shape: f32[1,128], index: 11, kind: input, shape index: {}]   ;;  %s2338_s12 = inlined_call_operand.hbm [shape: bf16[128,128], index: 12, kind: output, shape index: {}]  }
   0x1   :  { %19 = sst [smem:[#allocation6]] %s2328_s2 }
   0x2   :  { %20 = vsyncpa [#allocation8], 0 }
   0x3   :  { %21 = vsyncpa [#allocation11], 0 }
   0x4   :  { %22 = vsyncpa [#allocation9], 0  ;;  %s1853_s23 = smov [#allocation10]   ;;  %s1854_s25 = smov [#allocation7]  }
   0x5   :  { %s66_s24 = sshll.u32 %s1853_s23, 4  ;;  %s52_s26 = sshll.u32 %s1854_s25, 4  ;;  %s67_s24 = int_to_ptr.vmem [resolvable:$true] %s66_s24  ;;  %s53_s26 = int_to_ptr.vmem [resolvable:$true] %s52_s26 }
   0x6   :  { %s1775_s27 = scalar_lea.vmem %s67_s24, 1024  ;;  %p1780_p1 = scmp.lt.s32.totalorder %s67_s24, %s67_s24 }
   0x7   :  { %p1776_p0 = scmp.ne.s32.totalorder %s67_s24, %s1775_s27  ;;  %p1781_p2 = scmp.lt.s32.totalorder %s1775_s27, %s1775_s27 }
   0x9   :  { %p1782_p3 = por %p1781_p2, %p1780_p1 }
   0xb   :  { %p1783_p4 = pnand %p1782_p3, %p1776_p0 }
   0xd   :  { %1786 = shalt.err (!%p1783_p4)
}
   0xe   :  { %s1855_s28 = smov 64   ;;  %s1856_s29 = smov 4  }
   0xf   :  { %72 = dma.hbm_to_vmem [thread:$0]  %s2333_s7, 1024, %s67_s24, [#allocation11], %s1855_s28, %s1855_s28, %s1856_s29  }
  0x10   :  { %s1795_s13 = scalar_lea.vmem %s53_s26, 1024  ;;  %p1800_p6 = scmp.lt.s32.totalorder %s53_s26, %s53_s26 }
  0x11   :  { %p1796_p5 = scmp.ne.s32.totalorder %s53_s26, %s1795_s13  ;;  %p1801_p7 = scmp.lt.s32.totalorder %s1795_s13, %s1795_s13 }
  0x13   :  { %p1802_p8 = por %p1801_p7, %p1800_p6 }
  0x15   :  { %p1803_p9 = pnand %p1802_p8, %p1796_p5 }
  0x17   :  { %1806 = shalt.err (!%p1803_p9)
}
  0x18   :  { %58 = dma.hbm_to_vmem [thread:$0]  %s2331_s5, 1024, %s53_s26, [#allocation8], %s1855_s28, %s1855_s28, %s1856_s29  }
  0x19   :  { %s1857_s16 = smov [#allocation12]  }
  0x1a   :  { %s80_s17 = sshll.u32 %s1857_s16, 4  ;;  %s81_s17 = int_to_ptr.vmem [resolvable:$true] %s80_s17 }
  0x1b   :  { %s1815_s18 = scalar_lea.vmem %s81_s17, 1024  ;;  %p1820_p11 = scmp.lt.s32.totalorder %s81_s17, %s81_s17 }
  0x1c   :  { %p1816_p10 = scmp.ne.s32.totalorder %s81_s17, %s1815_s18  ;;  %p1821_p12 = scmp.lt.s32.totalorder %s1815_s18, %s1815_s18 }
  0x1e   :  { %p1822_p13 = por %p1821_p12, %p1820_p11 }
  0x20   :  { %p1823_p0 = pnand %p1822_p13, %p1816_p10 }
  0x22   :  { %1826 = shalt.err (!%p1823_p0)
}
  0x23   :  { %86 = dma.hbm_to_vmem [thread:$0]  %s2335_s9, 1024, %s81_s17, [#allocation11], %s1855_s28, %s1855_s28, %s1856_s29  }
  0x24   :  { %1847 = dma.done.wait [#allocation8], 1024  }
  0x25   :  { %1848 = vsyncadd [#allocation8], 4294966272 }
  0x26   :  { %1849 = dma.done.wait [#allocation11], 2048  }
  0x27   :  { %1850 = vsyncadd [#allocation11], 4294965248  ;;  %p115_p1 = scmp.lt.s32.totalorder %s2327_s1, 0  ;;  %s1399_s23 = sshll.u32 %s2327_s1, 4  ;;  %v1858_v0 = vmov 0.0  }
  0x28   :  { %p1953_p2 = scmp.lt.s32.totalorder %s1399_s23, 15  ;;  %136 = vst [vmem:[#allocation2 + $0x30] sm:$0xff] %v1858_v0  ;;  %137 = vst [vmem:[#allocation2] sm:$0xff] %v1858_v0  ;;  %p1401_p3 = scmp.eq.s32.totalorder %s2326_s0, 0 }
  0x29   :  { %138 = vst [vmem:[#allocation2 + $0x58] sm:$0xff] %v1858_v0  ;;  %139 = vst [vmem:[#allocation2 + $0x18] sm:$0xff] %v1858_v0  ;;  %s2341_s1 = smov (!%p115_p1, %s2327_s1), 0 }
  0x2a   :  { %140 = vst [vmem:[#allocation2 + $0x50] sm:$0xff] %v1858_v0  ;;  %141 = vst [vmem:[#allocation2 + $0x68] sm:$0xff] %v1858_v0  ;;  %s2343_s23 = smov (!%p1953_p2, %s1399_s23), 15  ;;  %s1398_s2 = sshll.u32 %s2341_s1, 2 }
  0x2b   :  { %142 = vst [vmem:[#allocation2 + $0x8] sm:$0xff] %v1858_v0  ;;  %143 = vst [vmem:[#allocation2 + $0x48] sm:$0xff] %v1858_v0  ;;  %s1985_s14 = scalar_lea.vmem %s2329_s3, %s1398_s2  ;;  %s1400_s15 = sshll.u32 %s2343_s23, 2 }
  0x2c   :  { %144 = vst [vmem:[#allocation2 + $0x40] sm:$0xff] %v1858_v0  ;;  %145 = vst [vmem:[#allocation2 + $0x20] sm:$0xff] %v1858_v0  ;;  %s1990_s18 = scalar_lea.vmem %s2330_s4, %s1400_s15  ;;  %157 = sbr.rel (%p1401_p3) target bundleno = 292 (0x124), region = 61 }
  0x2d   :  { %146 = vst [vmem:[#allocation2 + $0x10] sm:$0xff] %v1858_v0  ;;  %147 = vst [vmem:[#allocation2 + $0x38] sm:$0xff] %v1858_v0 }
  0x2e   :  { %148 = vst [vmem:[#allocation2 + $0x60] sm:$0xff] %v1858_v0  ;;  %149 = vst [vmem:[#allocation2 + $0x70] sm:$0xff] %v1858_v0 }
  0x2f   :  { %150 = vst [vmem:[#allocation2 + $0x78] sm:$0xff] %v1858_v0  ;;  %151 = vst [vmem:[#allocation2 + $0x28] sm:$0xff] %v1858_v0 }
  0x31   :  { %v1693_v1 = vld [vmem:[%s1990_s18 + $0x38] sm:$0xff]   ;;  %v1694_v2 = vld [vmem:[%s1990_s18 + $0x30] sm:$0xff]   ;;  %v1695_v3 = vld [vmem:[%s1990_s18 + $0x28] sm:$0xff]  }
  0x32   :  { %1573 = vmatprep.subr.bf16.mxu0 %v1693_v1  ;;  %1669 = vmatprep.subr.bf16.mxu1 %v1693_v1  ;;  %v1696_v4 = vld [vmem:[%s1990_s18 + $0x20] sm:$0xff]   ;;  %v1697_v7 = vld [vmem:[%s1990_s18 + $0x18] sm:$0xff]   ;;  %v1698_v8 = vld [vmem:[%s1990_s18 + $0x10] sm:$0xff]  }
  0x33   :  { %1574 = vmatpush3.bf16.msra.mxu0 %v1693_v1  ;;  %1677 = vmatpush3.bf16.msra.mxu1 %v1693_v1  ;;  %v1701_v5 = vld [vmem:[%s1985_s14] sm:$0xff]   ;;  %v1699_v9 = vld [vmem:[%s1990_s18 + $0x8] sm:$0xff]   ;;  %v1705_v13 = vld [vmem:[%s1985_s14 + $0x10] sm:$0xff]  }
  0x34   :  { %1575 = vmatprep.subr.bf16.mxu0 %v1694_v2  ;;  %1670 = vmatprep.subr.bf16.mxu1 %v1694_v2  ;;  %v1702_v6 = vld [vmem:[%s1985_s14 + $0x20] sm:$0xff]   ;;  %v1703_v11 = vld [vmem:[%s1985_s14 + $0x8] sm:$0xff]   ;;  %v1706_v14 = vld [vmem:[%s1985_s14 + $0x30] sm:$0xff]  }
  0x35   :  { %1589 = vmatprep.mubr.bf16.mxu0 %v1701_v5  ;;  %1597 = vmatprep.mubr.bf16.mxu1 %v1702_v6  ;;  %v1700_v10 = vld [vmem:[%s1990_s18] sm:$0xff]   ;;  %v1704_v12 = vld [vmem:[%s1985_s14 + $0x28] sm:$0xff]   ;;  %v1707_v15 = vld [vmem:[%s1985_s14 + $0x18] sm:$0xff]  }
  0x36   :  { %v1708_v16 = vld [vmem:[%s1985_s14 + $0x38] sm:$0xff]   ;;  %v168_v18 = vld [vmem:[#allocation2 + $0x10] sm:$0xff]  ;;  %v166_v22 = vld [vmem:[#allocation2 + $0x40] sm:$0xff] }
  0x37   :  { %1576 = vmatpush3.bf16.msra.mxu0 %v1694_v2  ;;  %1678 = vmatpush3.bf16.msra.mxu1 %v1694_v2  ;;  %v160_v17 = vld [vmem:[#allocation2 + $0x58] sm:$0xff]  ;;  %v158_v21 = vld [vmem:[#allocation2 + $0x30] sm:$0xff]  ;;  %v159_v33 = vld [vmem:[#allocation2] sm:$0xff] }
  0x38   :  { %1577 = vmatprep.subr.bf16.mxu0 %v1695_v3  ;;  %1671 = vmatprep.subr.bf16.mxu1 %v1695_v3  ;;  %v161_v27 = vld [vmem:[#allocation2 + $0x18] sm:$0xff]  ;;  %v167_v34 = vld [vmem:[#allocation2 + $0x20] sm:$0xff]  ;;  %v164_v39 = vld [vmem:[#allocation2 + $0x8] sm:$0xff] }
  0x39   :  { %v169_v28 = vld [vmem:[#allocation2 + $0x38] sm:$0xff]  ;;  %v162_v45 = vld [vmem:[#allocation2 + $0x50] sm:$0xff]  ;;  %v170_v46 = vld [vmem:[#allocation2 + $0x60] sm:$0xff] }
  0x3a   :  { %v172_v40 = vld [vmem:[#allocation2 + $0x78] sm:$0xff]  ;;  %v165_v51 = vld [vmem:[#allocation2 + $0x48] sm:$0xff]  ;;  %v171_v58 = vld [vmem:[#allocation2 + $0x70] sm:$0xff] }
  0x3b   :  { %1578 = vmatpush3.bf16.msra.mxu0 %v1695_v3  ;;  %1679 = vmatpush3.bf16.msra.mxu1 %v1695_v3  ;;  %v173_v52 = vld [vmem:[#allocation2 + $0x28] sm:$0xff] }
  0x3c   :  { %1579 = vmatprep.subr.bf16.mxu0 %v1696_v4  ;;  %1672 = vmatprep.subr.bf16.mxu1 %v1696_v4  ;;  %v163_v57 = vld [vmem:[#allocation2 + $0x68] sm:$0xff] }
  0x3f   :  { %1580 = vmatpush3.bf16.msra.mxu0 %v1696_v4  ;;  %1680 = vmatpush3.bf16.msra.mxu1 %v1696_v4 }
  0x40   :  { %1581 = vmatprep.subr.bf16.mxu0 %v1697_v7  ;;  %1673 = vmatprep.subr.bf16.mxu1 %v1697_v7 }
  0x43   :  { %1582 = vmatpush3.bf16.msra.mxu0 %v1697_v7  ;;  %1681 = vmatpush3.bf16.msra.mxu1 %v1697_v7 }
  0x44   :  { %1583 = vmatprep.subr.bf16.mxu0 %v1698_v8  ;;  %1674 = vmatprep.subr.bf16.mxu1 %v1698_v8 }
  0x47   :  { %1584 = vmatpush3.bf16.msra.mxu0 %v1698_v8  ;;  %1682 = vmatpush3.bf16.msra.mxu1 %v1698_v8 }
  0x48   :  { %1585 = vmatprep.subr.bf16.mxu0 %v1699_v9  ;;  %1675 = vmatprep.subr.bf16.mxu1 %v1699_v9 }
  0x4b   :  { %1586 = vmatpush3.bf16.msra.mxu0 %v1699_v9  ;;  %1683 = vmatpush3.bf16.msra.mxu1 %v1699_v9 }
  0x4c   :  { %1587 = vmatprep.subr.bf16.mxu0 %v1700_v10  ;;  %1676 = vmatprep.subr.bf16.mxu1 %v1700_v10 }
  0x4f   :  { %1588 = vmatpush3.bf16.msra.mxu0 %v1700_v10  ;;  %1684 = vmatpush3.bf16.msra.mxu1 %v1700_v10 }
  0x52   :  { %1590 = vmatmul.mubr.bf16.vlgmr.msra.gmra.mxu0 %v1703_v11  ;;  %1598 = vmatmul.mubr.bf16.vlgmr.msra.gmra.mxu1 %v1704_v12 }
  0x53   :  { %1593 = vmatprep.mubr.bf16.mxu0 %v1705_v13  ;;  %1601 = vmatprep.mubr.bf16.mxu1 %v1706_v14 }
  0x5a   :  { %1594 = vmatmul.mubr.bf16.gmra.mxu0 %v1707_v15  ;;  %1602 = vmatmul.mubr.bf16.gmra.mxu1 %v1708_v16 }
 0x112   :  { %v1591_v19 = vpop.f32.mrf.mxu0  ;;  %v1599_v20 = vpop.f32.mrf.mxu1 }
 0x113   :  { %v401_v23 = vadd.f32 %v1591_v19, %v160_v17  ;;  %v409_v24 = vadd.f32 %v1599_v20, %v168_v18 }
 0x114   :  { %v336_v25 = vpop.f32.mrf.mxu0  ;;  %v368_v26 = vpop.f32.mrf.mxu1 }
 0x115   :  { %417 = vst [vmem:[#allocation2 + $0x58] sm:$0xff] %v401_v23  ;;  %425 = vst [vmem:[#allocation2 + $0x10] sm:$0xff] %v409_v24  ;;  %v399_v29 = vadd.f32 %v336_v25, %v158_v21  ;;  %v407_v30 = vadd.f32 %v368_v26, %v166_v22 }
 0x116   :  { %v1592_v31 = vpop.f32.mrf.mxu0  ;;  %v1600_v32 = vpop.f32.mrf.mxu1 }
 0x117   :  { %415 = vst [vmem:[#allocation2 + $0x30] sm:$0xff] %v399_v29  ;;  %423 = vst [vmem:[#allocation2 + $0x40] sm:$0xff] %v407_v30  ;;  %v402_v35 = vadd.f32 %v1592_v31, %v161_v27  ;;  %v410_v36 = vadd.f32 %v1600_v32, %v169_v28 }
 0x118   :  { %v339_v37 = vpop.f32.mrf.mxu0  ;;  %v371_v38 = vpop.f32.mrf.mxu1 }
 0x119   :  { %418 = vst [vmem:[#allocation2 + $0x18] sm:$0xff] %v402_v35  ;;  %426 = vst [vmem:[#allocation2 + $0x38] sm:$0xff] %v410_v36  ;;  %v400_v41 = vadd.f32 %v339_v37, %v159_v33  ;;  %v408_v42 = vadd.f32 %v371_v38, %v167_v34 }
 0x11a   :  { %v1595_v43 = vpop.f32.mrf.mxu0  ;;  %v1603_v44 = vpop.f32.mrf.mxu1 }
 0x11b   :  { %416 = vst [vmem:[#allocation2] sm:$0xff] %v400_v41  ;;  %424 = vst [vmem:[#allocation2 + $0x20] sm:$0xff] %v408_v42  ;;  %v405_v47 = vadd.f32 %v1595_v43, %v164_v39  ;;  %v413_v48 = vadd.f32 %v1603_v44, %v172_v40 }
 0x11c   :  { %v352_v49 = vpop.f32.mrf.mxu0  ;;  %v384_v50 = vpop.f32.mrf.mxu1 }
 0x11d   :  { %421 = vst [vmem:[#allocation2 + $0x8] sm:$0xff] %v405_v47  ;;  %429 = vst [vmem:[#allocation2 + $0x78] sm:$0xff] %v413_v48  ;;  %v403_v53 = vadd.f32 %v352_v49, %v162_v45  ;;  %v411_v54 = vadd.f32 %v384_v50, %v170_v46 }
 0x11e   :  { %v1596_v55 = vpop.f32.mrf.mxu0  ;;  %v1604_v56 = vpop.f32.mrf.mxu1 }
 0x11f   :  { %419 = vst [vmem:[#allocation2 + $0x50] sm:$0xff] %v403_v53  ;;  %427 = vst [vmem:[#allocation2 + $0x60] sm:$0xff] %v411_v54  ;;  %v406_v59 = vadd.f32 %v1596_v55, %v165_v51  ;;  %v414_v60 = vadd.f32 %v1604_v56, %v173_v52 }
 0x120   :  { %v355_v61 = vpop.f32.mrf.mxu0  ;;  %v387_v62 = vpop.f32.mrf.mxu1 }
 0x121   :  { %422 = vst [vmem:[#allocation2 + $0x48] sm:$0xff] %v406_v59  ;;  %430 = vst [vmem:[#allocation2 + $0x28] sm:$0xff] %v414_v60  ;;  %v404_v63 = vadd.f32 %v355_v61, %v163_v57  ;;  %v412_v1 = vadd.f32 %v387_v62, %v171_v58 }
 0x123   :  { %420 = vst [vmem:[#allocation2 + $0x68] sm:$0xff] %v404_v63  ;;  %428 = vst [vmem:[#allocation2 + $0x70] sm:$0xff] %v412_v1 }
 0x124 PF:  { %v1711_v2 = vld [vmem:[#allocation10 + $0x38] sm:$0xff]   ;;  %v1859_v4 = vmov 0   ;;  %v1713_v5 = vld [vmem:[#allocation10 + $0x30] sm:$0xff]   ;;  %v1715_v7 = vld [vmem:[#allocation10 + $0x28] sm:$0xff]  }
 0x125   :  { %v1712_v3 = vld [vmem:[#allocation12 + $0x38] sm:$0xff]   ;;  %1710 = vset.pattern.permute.xlu1 %v1859_v4  ;;  %1709 = vset.pattern.permute.xlu0 %v1859_v4  ;;  %v1714_v6 = vld [vmem:[#allocation12 + $0x30] sm:$0xff]   ;;  %v1716_v8 = vld [vmem:[#allocation12 + $0x28] sm:$0xff]  }
 0x126   :  { %1605 = vmatprep.subr.bf16.mxu0 %v1711_v2  ;;  %1637 = vmatprep.subr.bf16.mxu1 %v1712_v3  ;;  %v1717_v9 = vld [vmem:[#allocation10 + $0x20] sm:$0xff]   ;;  %v1719_v11 = vld [vmem:[#allocation10 + $0x18] sm:$0xff]   ;;  %v1721_v13 = vld [vmem:[#allocation10 + $0x10] sm:$0xff]  }
 0x127   :  { %1606 = vmatpush3.bf16.msra.mxu0 %v1711_v2  ;;  %1638 = vmatpush3.bf16.msra.mxu1 %v1712_v3  ;;  %v1718_v10 = vld [vmem:[#allocation12 + $0x20] sm:$0xff]   ;;  %v1720_v12 = vld [vmem:[#allocation12 + $0x18] sm:$0xff]   ;;  %v434_v14 = vld [vmem:[#allocation2 + $0x30] sm:$0xff] }
 0x128   :  { %1607 = vmatprep.subr.bf16.mxu0 %v1713_v5  ;;  %1639 = vmatprep.subr.bf16.mxu1 %v1714_v6  ;;  %v435_v15 = vld [vmem:[#allocation2] sm:$0xff]  ;;  %v1722_v16 = vld [vmem:[#allocation12 + $0x10] sm:$0xff]   ;;  %v1723_v19 = vld [vmem:[#allocation10 + $0x8] sm:$0xff]  }
 0x129   :  { %v450_v17 = vpack.c.bf16 %v435_v15, %v434_v14  ;;  %v1727_v18 = vld [vmem:[#allocation7] sm:$0xff]   ;;  %v1724_v20 = vld [vmem:[#allocation12 + $0x8] sm:$0xff]   ;;  %v436_v23 = vld [vmem:[#allocation2 + $0x58] sm:$0xff] }
 0x12a   :  { %1653 = vmatprep.mubr.bf16.mxu1 %v1727_v18  ;;  %v1725_v21 = vld [vmem:[#allocation10] sm:$0xff]   ;;  %v437_v24 = vld [vmem:[#allocation2 + $0x18] sm:$0xff]  ;;  %v438_v25 = vld [vmem:[#allocation2 + $0x50] sm:$0xff] }
 0x12b   :  { %1608 = vmatpush3.bf16.msra.mxu0 %v1713_v5  ;;  %1640 = vmatpush3.bf16.msra.mxu1 %v1714_v6  ;;  %v1726_v22 = vld [vmem:[#allocation12] sm:$0xff]   ;;  %v439_v26 = vld [vmem:[#allocation2 + $0x68] sm:$0xff]  ;;  %v628_v27 = vld [vmem:[%s2332_s6 + $0x10] sm:$0xff]  ;;  %v451_v28 = vpack.c.bf16 %v437_v24, %v436_v23 }
 0x12c   :  { %1609 = vmatprep.subr.bf16.mxu0 %v1715_v7  ;;  %1641 = vmatprep.subr.bf16.mxu1 %v1716_v8  ;;  %v626_v29 = vld [vmem:[%s2332_s6] sm:$0xff]  ;;  %v1728_v30 = vld [vmem:[#allocation7 + $0x8] sm:$0xff]   ;;  %v452_v31 = vpack.c.bf16 %v439_v26, %v438_v25  ;;  %v629_v32 = vld [vmem:[%s2332_s6 + $0x18] sm:$0xff] }
 0x12d   :  { %1621 = vmatprep.mubr.bf16.mxu0 %v450_v17  ;;  %654 = vperm.xlu1 %1710, %v628_v27   ;;  %v1729_v33 = vld [vmem:[#allocation7 + $0x10] sm:$0xff]   ;;  %v627_v34 = vld [vmem:[%s2332_s6 + $0x8] sm:$0xff]  ;;  %v442_v38 = vld [vmem:[#allocation2 + $0x40] sm:$0xff] }
 0x12e   :  { %644 = vperm.xlu0 %1709, %v626_v29   ;;  %v440_v35 = vld [vmem:[#allocation2 + $0x8] sm:$0xff]  ;;  %v443_v39 = vld [vmem:[#allocation2 + $0x20] sm:$0xff]  ;;  %v1730_v42 = vld [vmem:[#allocation7 + $0x18] sm:$0xff]  }
 0x12f   :  { %1610 = vmatpush3.bf16.msra.mxu0 %v1715_v7  ;;  %1642 = vmatpush3.bf16.msra.mxu1 %v1716_v8  ;;  %v441_v36 = vld [vmem:[#allocation2 + $0x48] sm:$0xff]  ;;  %v630_v40 = vld [vmem:[%s2332_s6 + $0x20] sm:$0xff]  ;;  %v454_v43 = vpack.c.bf16 %v443_v39, %v442_v38  ;;  %v633_v44 = vld [vmem:[%s2332_s6 + $0x38] sm:$0xff]  ;;  %v979_v7 = vlaneseq }
 0x130   :  { %1611 = vmatprep.subr.bf16.mxu0 %v1717_v9  ;;  %1643 = vmatprep.subr.bf16.mxu1 %v1718_v10  ;;  %v631_v37 = vld [vmem:[%s2332_s6 + $0x28] sm:$0xff]  ;;  %v453_v41 = vpack.c.bf16 %v441_v36, %v440_v35  ;;  %v1731_v45 = vld [vmem:[#allocation7 + $0x20] sm:$0xff]   ;;  %v632_v46 = vld [vmem:[%s2332_s6 + $0x30] sm:$0xff] }
 0x131   :  { %659 = vperm.xlu1 %1710, %v629_v32   ;;  %v444_v47 = vld [vmem:[#allocation2 + $0x10] sm:$0xff]  ;;  %v445_v48 = vld [vmem:[#allocation2 + $0x38] sm:$0xff]  ;;  %v635_v49 = vld [vmem:[%s2332_s6 + $0x48] sm:$0xff] }
 0x132   :  { %649 = vperm.xlu0 %1709, %v627_v34   ;;  %v446_v50 = vld [vmem:[#allocation2 + $0x60] sm:$0xff]  ;;  %v447_v51 = vld [vmem:[#allocation2 + $0x70] sm:$0xff]  ;;  %v455_v53 = vpack.c.bf16 %v445_v48, %v444_v47  ;;  %v1732_v54 = vld [vmem:[#allocation7 + $0x28] sm:$0xff]  }
 0x133   :  { %1612 = vmatpush3.bf16.msra.mxu0 %v1717_v9  ;;  %1644 = vmatpush3.bf16.msra.mxu1 %v1718_v10  ;;  %v634_v52 = vld [vmem:[%s2332_s6 + $0x40] sm:$0xff]  ;;  %v456_v55 = vpack.c.bf16 %v447_v51, %v446_v50  ;;  %v637_v56 = vld [vmem:[%s2332_s6 + $0x58] sm:$0xff]  ;;  %v1733_v57 = vld [vmem:[#allocation7 + $0x30] sm:$0xff]   ;;  %v980_v9 = vand.u32 127, %v979_v7 }
 0x134   :  { %1613 = vmatprep.subr.bf16.mxu0 %v1719_v11  ;;  %1645 = vmatprep.subr.bf16.mxu1 %v1720_v12  ;;  %v636_v58 = vld [vmem:[%s2332_s6 + $0x50] sm:$0xff]  ;;  %v448_v59 = vld [vmem:[#allocation2 + $0x78] sm:$0xff]  ;;  %v449_v60 = vld [vmem:[#allocation2 + $0x28] sm:$0xff] }
 0x135   :  { %669 = vperm.xlu1 %1710, %v631_v37   ;;  %v639_v61 = vld [vmem:[%s2332_s6 + $0x68] sm:$0xff]  ;;  %v638_v62 = vld [vmem:[%s2332_s6 + $0x60] sm:$0xff]  ;;  %v457_v63 = vpack.c.bf16 %v449_v60, %v448_v59  ;;  %v1734_v1 = vld [vmem:[#allocation7 + $0x38] sm:$0xff]   ;;  %vm981_vm0 = vcmp.lt.s32.totalorder %v980_v9, 32 }
 0x136   :  { %664 = vperm.xlu0 %1709, %v630_v40   ;;  %v641_v2 = vld [vmem:[%s2332_s6 + $0x78] sm:$0xff]  ;;  %v640_v3 = vld [vmem:[%s2332_s6 + $0x70] sm:$0xff]  ;;  %s1238_s6 = sld [smem:[#allocation6]] }
 0x137   :  { %1614 = vmatpush3.bf16.msra.mxu0 %v1719_v11  ;;  %1646 = vmatpush3.bf16.msra.mxu1 %v1720_v12  ;;  %v2062_v11 = vld [vmem:[%s2334_s8] ss:$0 sm:$0xff] }
 0x138   :  { %1615 = vmatprep.subr.bf16.mxu0 %v1721_v13  ;;  %1647 = vmatprep.subr.bf16.mxu1 %v1722_v16 }
 0x139   :  { %679 = vperm.xlu1 %1710, %v633_v44  }
 0x13a   :  { %674 = vperm.xlu0 %1709, %v632_v46  }
 0x13b   :  { %1616 = vmatpush3.bf16.msra.mxu0 %v1721_v13  ;;  %1648 = vmatpush3.bf16.msra.mxu1 %v1722_v16 }
 0x13c   :  { %1617 = vmatprep.subr.bf16.mxu0 %v1723_v19  ;;  %1649 = vmatprep.subr.bf16.mxu1 %v1724_v20 }
 0x13d   :  { %689 = vperm.xlu1 %1710, %v635_v49  }
 0x13e   :  { %684 = vperm.xlu0 %1709, %v634_v52  }
 0x13f   :  { %1618 = vmatpush3.bf16.msra.mxu0 %v1723_v19  ;;  %1650 = vmatpush3.bf16.msra.mxu1 %v1724_v20 }
 0x140   :  { %1619 = vmatprep.subr.bf16.mxu0 %v1725_v21  ;;  %1651 = vmatprep.subr.bf16.mxu1 %v1726_v22 }
 0x141   :  { %699 = vperm.xlu1 %1710, %v637_v56  }
 0x142   :  { %694 = vperm.xlu0 %1709, %v636_v58  }
 0x143   :  { %1620 = vmatpush3.bf16.msra.mxu0 %v1725_v21  ;;  %1652 = vmatpush3.bf16.msra.mxu1 %v1726_v22  ;;  %v2067_v22 = vsel %vm981_vm0, 1.0, %v1858_v0 }
 0x145   :  { %709 = vperm.xlu1 %1710, %v639_v61  }
 0x146   :  { %1622 = vmatmul.mubr.bf16.vlgmr.msra.gmra.mxu0 %v451_v28  ;;  %1654 = vmatmul.mubr.bf16.vlgmr.msra.gmra.mxu1 %v1728_v30 }
 0x147   :  { %1625 = vmatprep.mubr.bf16.mxu0 %v452_v31  ;;  %1657 = vmatprep.mubr.bf16.mxu1 %v1729_v33 }
 0x148   :  { %704 = vperm.xlu0 %1709, %v638_v62  }
 0x149   :  { %719 = vperm.xlu1 %1710, %v641_v2  }
 0x14c   :  { %714 = vperm.xlu0 %1709, %v640_v3  }
 0x14e   :  { %1626 = vmatmul.mubr.bf16.gmra.mxu0 %v453_v41  ;;  %1658 = vmatmul.mubr.bf16.gmra.mxu1 %v1730_v42 }
 0x14f   :  { %1629 = vmatprep.mubr.bf16.mxu0 %v454_v43  ;;  %1661 = vmatprep.mubr.bf16.mxu1 %v1731_v45 }
 0x156   :  { %1630 = vmatmul.mubr.bf16.gmra.mxu0 %v455_v53  ;;  %1662 = vmatmul.mubr.bf16.gmra.mxu1 %v1732_v54 }
 0x157   :  { %1633 = vmatprep.mubr.bf16.mxu0 %v456_v55  ;;  %1665 = vmatprep.mubr.bf16.mxu1 %v1733_v57 }
 0x15e   :  { %1634 = vmatmul.mubr.bf16.gmra.mxu0 %v457_v63  ;;  %1666 = vmatmul.mubr.bf16.gmra.mxu1 %v1734_v1 }
 0x1a8   :  { %v655_v5 = vpop.permute.xlu1 %654 }
 0x1a9   :  { %v645_v4 = vpop.permute.xlu0 %644 }
 0x1ac   :  { %v660_v8 = vpop.permute.xlu1 %659 }
 0x1ad   :  { %v650_v6 = vpop.permute.xlu0 %649 }
 0x1b0   :  { %v670_v15 = vpop.permute.xlu1 %669 }
 0x1b1   :  { %v665_v10 = vpop.permute.xlu0 %664 }
 0x1b4   :  { %v680_v33 = vpop.permute.xlu1 %679 }
 0x1b5   :  { %v675_v20 = vpop.permute.xlu0 %674 }
 0x1b8   :  { %v690_v51 = vpop.permute.xlu1 %689 }
 0x1b9   :  { %v685_v37 = vpop.permute.xlu0 %684 }
 0x1bd   :  { %v695_v57 = vpop.permute.xlu0 %694 }
 0x206   :  { %v1623_v12 = vpop.f32.mrf.mxu0  ;;  %v1655_v14 = vpop.f32.mrf.mxu1 }
 0x207   :  { %v572_v13 = vadd.f32 %v1623_v12, %v2062_v11 }
 0x208   :  { %v563_v16 = vpop.f32.mrf.mxu0  ;;  %v900_v18 = vpop.f32.mrf.mxu1 }
 0x209   :  { %v724_v17 = vmul.f32 %v655_v5, %v572_v13  ;;  %v564_v19 = vadd.f32 %v2062_v11, %v563_v16  ;;  %v705_v16 = vpop.permute.xlu0 %704 }
 0x20a   :  { %v1624_v21 = vpop.f32.mrf.mxu0  ;;  %v1656_v26 = vpop.f32.mrf.mxu1 }
 0x20b   :  { %v2069_v23 = vadd.f32 %v1655_v14, %v724_v17  ;;  %v722_v24 = vmul.f32 %v645_v4, %v564_v19  ;;  %v575_v25 = vadd.f32 %v1624_v21, %v2062_v11 }
 0x20c   :  { %v566_v27 = vpop.f32.mrf.mxu0  ;;  %v903_v29 = vpop.f32.mrf.mxu1 }
 0x20d   :  { %v725_v28 = vmul.f32 %v660_v8, %v575_v25  ;;  %v567_v30 = vadd.f32 %v2062_v11, %v566_v27  ;;  %v986_v31 = vmul.f32 %v2067_v22, %v2069_v23  ;;  %v2075_v32 = vadd.f32 %v900_v18, %v722_v24  ;;  %v700_v8 = vpop.permute.xlu1 %699 }
 0x20e   :  { %v1627_v34 = vpop.f32.mrf.mxu0  ;;  %v1659_v36 = vpop.f32.mrf.mxu1 }
 0x20f   :  { %v723_v0 = vmul.f32 %v650_v6, %v567_v30  ;;  %v588_v35 = vadd.f32 %v1627_v34, %v2062_v11  ;;  %1004 = vadd.xlane.f32.xlu0 %v986_v31  ;;  %v2078_v38 = vadd.f32 %v1656_v26, %v725_v28  ;;  %v984_v43 = vmul.f32 %v2067_v22, %v2075_v32 }
 0x210   :  { %v579_v39 = vpop.f32.mrf.mxu0  ;;  %v916_v42 = vpop.f32.mrf.mxu1 }
 0x211   :  { %v728_v40 = vmul.f32 %v675_v20, %v588_v35  ;;  %v580_v41 = vadd.f32 %v2062_v11, %v579_v39  ;;  %v2083_v44 = vadd.f32 %v903_v29, %v723_v0  ;;  %v987_v56 = vmul.f32 %v2067_v22, %v2078_v38  ;;  %v710_v31 = vpop.permute.xlu1 %709 }
 0x212   :  { %v1628_v45 = vpop.f32.mrf.mxu0  ;;  %v1660_v49 = vpop.f32.mrf.mxu1 }
 0x213   :  { %v2085_v46 = vadd.f32 %v1659_v36, %v728_v40  ;;  %v726_v47 = vmul.f32 %v665_v10, %v580_v41  ;;  %v591_v48 = vadd.f32 %v1628_v45, %v2062_v11  ;;  %1000 = vadd.xlane.f32.xlu0 %v984_v43  ;;  %v985_v50 = vmul.f32 %v2067_v22, %v2083_v44 }
 0x214   :  { %v582_v52 = vpop.f32.mrf.mxu0  ;;  %v919_v55 = vpop.f32.mrf.mxu1 }
 0x215   :  { %v729_v53 = vmul.f32 %v680_v33, %v591_v48  ;;  %v583_v54 = vadd.f32 %v2062_v11, %v582_v52  ;;  %1002 = vadd.xlane.f32.xlu1 %v985_v50  ;;  %v2093_v58 = vadd.f32 %v916_v42, %v726_v47  ;;  %v990_v1 = vmul.f32 %v2067_v22, %v2085_v46 }
 0x216   :  { %v1631_v59 = vpop.f32.mrf.mxu0  ;;  %v1663_v63 = vpop.f32.mrf.mxu1 }
 0x217   :  { %v2095_v60 = vadd.f32 %v1660_v49, %v729_v53  ;;  %v727_v61 = vmul.f32 %v670_v15, %v583_v54  ;;  %v604_v62 = vadd.f32 %v1631_v59, %v2062_v11  ;;  %1006 = vadd.xlane.f32.xlu0 %v987_v56  ;;  %v988_v15 = vmul.f32 %v2067_v22, %v2093_v58 }
 0x218   :  { %v595_v2 = vpop.f32.mrf.mxu0  ;;  %v932_v6 = vpop.f32.mrf.mxu1 }
 0x219   :  { %v2100_v3 = vadd.f32 %v919_v55, %v727_v61  ;;  %v732_v4 = vmul.f32 %v695_v57, %v604_v62  ;;  %v596_v5 = vadd.f32 %v2062_v11, %v595_v2  ;;  %1012 = vadd.xlane.f32.xlu1 %v990_v1  ;;  %v991_v7 = vmul.f32 %v2067_v22, %v2095_v60 }
 0x21a   :  { %v1632_v9 = vpop.f32.mrf.mxu0  ;;  %v1664_v14 = vpop.f32.mrf.mxu1 }
 0x21b   :  { %v2105_v10 = vadd.f32 %v1663_v63, %v732_v4  ;;  %v730_v12 = vmul.f32 %v685_v37, %v596_v5  ;;  %v607_v13 = vadd.f32 %v1632_v9, %v2062_v11  ;;  %1014 = vadd.xlane.f32.xlu0 %v991_v7  ;;  %v989_v21 = vmul.f32 %v2067_v22, %v2100_v3  ;;  %v715_v37 = vpop.permute.xlu0 %714 }
 0x21c   :  { %v598_v17 = vpop.f32.mrf.mxu0  ;;  %v935_v20 = vpop.f32.mrf.mxu1 }
 0x21d   :  { %v733_v18 = vmul.f32 %v700_v8, %v607_v13  ;;  %v599_v19 = vadd.f32 %v2062_v11, %v598_v17  ;;  %1008 = vadd.xlane.f32.xlu1 %v988_v15  ;;  %v2113_v24 = vadd.f32 %v932_v6, %v730_v12  ;;  %v994_v30 = vmul.f32 %v2067_v22, %v2105_v10 }
 0x21e   :  { %v1635_v25 = vpop.f32.mrf.mxu0  ;;  %v1667_v29 = vpop.f32.mrf.mxu1 }
 0x21f   :  { %v2115_v26 = vadd.f32 %v1664_v14, %v733_v18  ;;  %v731_v27 = vmul.f32 %v690_v51, %v599_v19  ;;  %v620_v28 = vadd.f32 %v1635_v25, %v2062_v11  ;;  %1010 = vadd.xlane.f32.xlu0 %v989_v21  ;;  %v992_v43 = vmul.f32 %v2067_v22, %v2113_v24  ;;  %v720_v51 = vpop.permute.xlu1 %719 }
 0x220   :  { %v611_v33 = vpop.f32.mrf.mxu0  ;;  %v948_v35 = vpop.f32.mrf.mxu1 }
 0x221   :  { %v2120_v34 = vadd.f32 %v935_v20, %v731_v27  ;;  %v612_v0 = vadd.f32 %v2062_v11, %v611_v33  ;;  %1020 = vadd.xlane.f32.xlu1 %v994_v30  ;;  %v995_v36 = vmul.f32 %v2067_v22, %v2115_v26  ;;  %v736_v40 = vmul.f32 %v715_v37, %v620_v28 }
 0x222   :  { %v1636_v39 = vpop.f32.mrf.mxu0  ;;  %v1668_v45 = vpop.f32.mrf.mxu1 }
 0x223   :  { %v734_v41 = vmul.f32 %v705_v16, %v612_v0  ;;  %v623_v42 = vadd.f32 %v1636_v39, %v2062_v11  ;;  %1022 = vadd.xlane.f32.xlu0 %v995_v36  ;;  %v993_v50 = vmul.f32 %v2067_v22, %v2120_v34  ;;  %v2133_v52 = vadd.f32 %v1667_v29, %v736_v40 }
 0x224   :  { %v614_v47 = vpop.f32.mrf.mxu0  ;;  %v951_v56 = vpop.f32.mrf.mxu1 }
 0x225   :  { %v2128_v48 = vadd.f32 %v948_v35, %v734_v41  ;;  %v615_v49 = vadd.f32 %v2062_v11, %v614_v47  ;;  %1016 = vadd.xlane.f32.xlu1 %v992_v43  ;;  %v737_v53 = vmul.f32 %v720_v51, %v623_v42  ;;  %v998_v11 = vmul.f32 %v2067_v22, %v2133_v52 }
 0x227   :  { %v735_v54 = vmul.f32 %v710_v31, %v615_v49  ;;  %1018 = vadd.xlane.f32.xlu0 %v993_v50  ;;  %v996_v55 = vmul.f32 %v2067_v22, %v2128_v48  ;;  %v2139_v59 = vadd.f32 %v1668_v45, %v737_v53 }
 0x229   :  { %v2137_v57 = vadd.f32 %v951_v56, %v735_v54  ;;  %1024 = vadd.xlane.f32.xlu1 %v996_v55  ;;  %v999_v62 = vmul.f32 %v2067_v22, %v2139_v59 }
 0x22b   :  { %v997_v61 = vmul.f32 %v2067_v22, %v2137_v57 }
 0x22d   :  { %1028 = vadd.xlane.f32.xlu1 %v998_v11  ;;  %1026 = vadd.xlane.f32.xlu0 %v997_v61 }
 0x231   :  { %1030 = vadd.xlane.f32.xlu0 %v999_v62 }
 0x298   :  { %v1005_v63 = vpop.xlane.xlu0 %1004 }
 0x299   :  { %v1034_v1 = vmul.f32 0.03125, %v1005_v63 }
 0x29b   :  { %v1050_v2 = vsub.f32 %v2069_v23, %v1034_v1 }
 0x29c   :  { %v1001_v4 = vpop.xlane.xlu0 %1000 }
 0x29d   :  { %v1032_v5 = vmul.f32 0.03125, %v1001_v4  ;;  %v2149_v6 = vmul.f32 %v2067_v22, %v1050_v2 }
 0x29e   :  { %v1003_v7 = vpop.xlane.xlu1 %1002 }
 0x29f   :  { %v1048_v8 = vsub.f32 %v2075_v32, %v1032_v5  ;;  %v1033_v9 = vmul.f32 0.03125, %v1003_v7  ;;  %v1082_v12 = vmul.f32 %v2149_v6, %v2149_v6 }
 0x2a0   :  { %v1007_v13 = vpop.xlane.xlu0 %1006 }
 0x2a1   :  { %v1035_v14 = vmul.f32 0.03125, %v1007_v13  ;;  %1100 = vadd.xlane.f32.xlu1 %v1082_v12  ;;  %v2155_v15 = vmul.f32 %v2067_v22, %v1048_v8  ;;  %v1049_v23 = vsub.f32 %v2083_v44, %v1033_v9 }
 0x2a2   :  { %v1013_v16 = vpop.xlane.xlu1 %1012 }
 0x2a3   :  { %v1051_v17 = vsub.f32 %v2078_v38, %v1035_v14  ;;  %v1038_v18 = vmul.f32 0.03125, %v1013_v16  ;;  %v1080_v19 = vmul.f32 %v2155_v15, %v2155_v15  ;;  %v2166_v28 = vmul.f32 %v2067_v22, %v1049_v23 }
 0x2a4   :  { %v1015_v32 = vpop.xlane.xlu0 %1014 }
 0x2a5   :  { %v1054_v20 = vsub.f32 %v2085_v46, %v1038_v18  ;;  %v1039_v21 = vmul.f32 0.03125, %v1015_v32  ;;  %1096 = vadd.xlane.f32.xlu1 %v1080_v19  ;;  %v2163_v25 = vmul.f32 %v2067_v22, %v1051_v17  ;;  %v1081_v39 = vmul.f32 %v2166_v28, %v2166_v28 }
 0x2a6   :  { %v1009_v27 = vpop.xlane.xlu1 %1008 }
 0x2a7   :  { %v1055_v44 = vsub.f32 %v2095_v60, %v1039_v21  ;;  %v1036_v29 = vmul.f32 0.03125, %v1009_v27  ;;  %v1083_v38 = vmul.f32 %v2163_v25, %v2163_v25  ;;  %v2172_v30 = vmul.f32 %v2067_v22, %v1054_v20 }
 0x2a8   :  { %v1011_v31 = vpop.xlane.xlu0 %1010 }
 0x2a9   :  { %v1052_v46 = vsub.f32 %v2093_v58, %v1036_v29  ;;  %v1037_v33 = vmul.f32 0.03125, %v1011_v31  ;;  %1102 = vadd.xlane.f32.xlu0 %v1083_v38  ;;  %v1086_v0 = vmul.f32 %v2172_v30, %v2172_v30  ;;  %v2178_v36 = vmul.f32 %v2067_v22, %v1055_v44 }
 0x2aa   :  { %v1021_v35 = vpop.xlane.xlu1 %1020 }
 0x2ab   :  { %v1053_v60 = vsub.f32 %v2100_v3, %v1037_v33  ;;  %v1042_v37 = vmul.f32 0.03125, %v1021_v35  ;;  %1108 = vadd.xlane.f32.xlu1 %v1086_v0  ;;  %v2184_v40 = vmul.f32 %v2067_v22, %v1052_v46  ;;  %v1087_v3 = vmul.f32 %v2178_v36, %v2178_v36 }
 0x2ac   :  { %v1023_v58 = vpop.xlane.xlu0 %1022 }
 0x2ad   :  { %v1058_v41 = vsub.f32 %v2105_v10, %v1042_v37  ;;  %v1043_v42 = vmul.f32 0.03125, %v1023_v58  ;;  %1098 = vadd.xlane.f32.xlu0 %v1081_v39  ;;  %v1084_v43 = vmul.f32 %v2184_v40, %v2184_v40  ;;  %v2196_v51 = vmul.f32 %v2067_v22, %v1053_v60 }
 0x2ae   :  { %v1017_v45 = vpop.xlane.xlu1 %1016 }
 0x2af   :  { %v1059_v47 = vsub.f32 %v2115_v26, %v1043_v42  ;;  %v1040_v49 = vmul.f32 0.03125, %v1017_v45  ;;  %1104 = vadd.xlane.f32.xlu1 %v1084_v43  ;;  %v2193_v50 = vmul.f32 %v2067_v22, %v1058_v41  ;;  %v1085_v62 = vmul.f32 %v2196_v51, %v2196_v51 }
 0x2b0   :  { %v1019_v10 = vpop.xlane.xlu0 %1018 }
 0x2b1   :  { %v1056_v53 = vsub.f32 %v2113_v24, %v1040_v49  ;;  %v1041_v54 = vmul.f32 0.03125, %v1019_v10  ;;  %1110 = vadd.xlane.f32.xlu0 %v1087_v3  ;;  %v1090_v55 = vmul.f32 %v2193_v50, %v2193_v50  ;;  %v2202_v11 = vmul.f32 %v2067_v22, %v1059_v47 }
 0x2b2   :  { %v1025_v56 = vpop.xlane.xlu1 %1024 }
 0x2b3   :  { %v1057_v26 = vsub.f32 %v2120_v34, %v1041_v54  ;;  %v1044_v61 = vmul.f32 0.03125, %v1025_v56  ;;  %1116 = vadd.xlane.f32.xlu1 %v1090_v55  ;;  %v2208_v63 = vmul.f32 %v2067_v22, %v1056_v53  ;;  %v1091_v5 = vmul.f32 %v2202_v11, %v2202_v11  ;;  %v2247_v55 = vld [vmem:[%s2336_s10] ss:$0 sm:$0xff]  ;;  %s1860_s10 = smov [#allocation13]  }
 0x2b5   :  { %v1060_v24 = vsub.f32 %v2128_v48, %v1044_v61  ;;  %1106 = vadd.xlane.f32.xlu0 %v1085_v62  ;;  %v1088_v1 = vmul.f32 %v2208_v63, %v2208_v63  ;;  %v2219_v9 = vmul.f32 %v2067_v22, %v1057_v26 }
 0x2b6   :  { %v1029_v2 = vpop.xlane.xlu1 %1028  ;;  %v1027_v4 = vpop.xlane.xlu0 %1026 }
 0x2b7   :  { %v1046_v34 = vmul.f32 0.03125, %v1029_v2  ;;  %v1045_v7 = vmul.f32 0.03125, %v1027_v4  ;;  %1112 = vadd.xlane.f32.xlu1 %v1088_v1  ;;  %v2216_v8 = vmul.f32 %v2067_v22, %v1060_v24  ;;  %v1089_v16 = vmul.f32 %v2219_v9, %v2219_v9 }
 0x2b9   :  { %v1062_v48 = vsub.f32 %v2133_v52, %v1046_v34  ;;  %v1061_v12 = vsub.f32 %v2137_v57, %v1045_v7  ;;  %1118 = vadd.xlane.f32.xlu0 %v1091_v5  ;;  %v1092_v13 = vmul.f32 %v2216_v8, %v2216_v8 }
 0x2ba   :  { %v1031_v14 = vpop.xlane.xlu0 %1030 }
 0x2bb   :  { %v1047_v23 = vmul.f32 0.03125, %v1031_v14  ;;  %1120 = vadd.xlane.f32.xlu1 %v1092_v13  ;;  %v2228_v17 = vmul.f32 %v2067_v22, %v1062_v48  ;;  %v2231_v18 = vmul.f32 %v2067_v22, %v1061_v12 }
 0x2bd   :  { %v1063_v52 = vsub.f32 %v2139_v59, %v1047_v23  ;;  %1114 = vadd.xlane.f32.xlu0 %v1089_v16  ;;  %v1094_v57 = vmul.f32 %v2228_v17, %v2228_v17  ;;  %v1093_v19 = vmul.f32 %v2231_v18, %v2231_v18 }
 0x2bf   :  { %1124 = vadd.xlane.f32.xlu1 %v1094_v57  ;;  %v2239_v32 = vmul.f32 %v2067_v22, %v1063_v52  ;;  %v2258_v52 = vstv %s1238_s6 }
 0x2c1   :  { %1122 = vadd.xlane.f32.xlu0 %v1093_v19  ;;  %v1095_v20 = vmul.f32 %v2239_v32, %v2239_v32 }
 0x2c5   :  { %1126 = vadd.xlane.f32.xlu0 %v1095_v20 }
 0x32a   :  { %v1101_v21 = vpop.xlane.xlu1 %1100 }
 0x32b   :  { %v1130_v27 = vmul.f32 0.03125, %v1101_v21 }
 0x32d   :  { %v1146_v44 = vadd.f32 1e-05, %v1130_v27 }
 0x32e   :  { %v1097_v59 = vpop.xlane.xlu1 %1096 }
 0x32f   :  { %1735 = vrsqrt.f32 %v1146_v44  ;;  %v1128_v29 = vmul.f32 0.03125, %v1097_v59 }
 0x331   :  { %v1144_v38 = vadd.f32 1e-05, %v1128_v29 }
 0x332   :  { %v1103_v31 = vpop.xlane.xlu0 %1102 }
 0x333   :  { %1737 = vrsqrt.f32 %v1144_v38  ;;  %v1131_v46 = vmul.f32 0.03125, %v1103_v31 }
 0x334   :  { %v1109_v33 = vpop.xlane.xlu1 %1108 }
 0x335   :  { %v1147_v0 = vadd.f32 1e-05, %v1131_v46  ;;  %v1134_v35 = vmul.f32 0.03125, %v1109_v33 }
 0x336   :  { %v1099_v22 = vpop.xlane.xlu0 %1098 }
 0x337   :  { %1739 = vrsqrt.f32 %v1147_v0  ;;  %v1150_v60 = vadd.f32 1e-05, %v1134_v35  ;;  %v1129_v37 = vmul.f32 0.03125, %v1099_v22 }
 0x338   :  { %v1105_v39 = vpop.xlane.xlu1 %1104 }
 0x339   :  { %1741 = vrsqrt.f32 %v1150_v60  ;;  %v1145_v58 = vadd.f32 1e-05, %v1129_v37  ;;  %v1132_v41 = vmul.f32 0.03125, %v1105_v39 }
 0x33a   :  { %v1111_v42 = vpop.xlane.xlu0 %1110 }
 0x33b   :  { %1743 = vrsqrt.f32 %v1145_v58  ;;  %v1148_v43 = vadd.f32 1e-05, %v1132_v41  ;;  %v1135_v45 = vmul.f32 0.03125, %v1111_v42 }
 0x33c   :  { %v1736_v3 = vpop.eup %1735  ;;  %v1117_v47 = vpop.xlane.xlu1 %1116 }
 0x33d   :  { %1745 = vrsqrt.f32 %v1148_v43  ;;  %v1151_v49 = vadd.f32 1e-05, %v1135_v45  ;;  %v1138_v10 = vmul.f32 0.03125, %v1117_v47  ;;  %v1178_v53 = vmul.f32 %v1736_v3, %v2149_v6  ;;  %v2254_v6 = vld [vmem:[%s2337_s11] ss:$0 sm:$0xff]  ;;  %s1373_s11 = sshll.u32 %s1860_s10, 4  ;;  %s1374_s11 = int_to_ptr.vmem [resolvable:$true] %s1373_s11 }
 0x33e   :  { %v1107_v54 = vpop.xlane.xlu0 %1106  ;;  %s1827_s27 = scalar_lea.vmem %s1374_s11, 1024  ;;  %p1832_p5 = scmp.lt.s32.totalorder %s1374_s11, %s1374_s11 }
 0x33f   :  { %1747 = vrsqrt.f32 %v1151_v49  ;;  %v1154_v56 = vadd.f32 1e-05, %v1138_v10  ;;  %v1133_v26 = vmul.f32 0.03125, %v1107_v54  ;;  %v1201_v2 = vmul.f32 %v2247_v55, %v1178_v53  ;;  %p1828_p4 = scmp.ne.s32.totalorder %s1374_s11, %s1827_s27  ;;  %p1833_p6 = scmp.lt.s32.totalorder %s1827_s27, %s1827_s27 }
 0x340   :  { %v1738_v61 = vpop.eup %1737  ;;  %v1113_v62 = vpop.xlane.xlu1 %1112 }
 0x341   :  { %v1176_v24 = vmul.f32 %v1738_v61, %v2155_v15  ;;  %1749 = vrsqrt.f32 %v1154_v56  ;;  %v1149_v1 = vadd.f32 1e-05, %v1133_v26  ;;  %v1136_v4 = vmul.f32 0.03125, %v1113_v62  ;;  %p1834_p7 = por %p1833_p6, %p1832_p5 }
 0x342   :  { %v1119_v5 = vpop.xlane.xlu0 %1118  ;;  %v1224_v57 = vadd.f32 %v2254_v6, %v1201_v2 }
 0x343   :  { %v1199_v34 = vmul.f32 %v2247_v55, %v1176_v24  ;;  %1751 = vrsqrt.f32 %v1149_v1  ;;  %v1139_v7 = vmul.f32 0.03125, %v1119_v5  ;;  %v1152_v12 = vadd.f32 1e-05, %v1136_v4  ;;  %p1835_p8 = pnand %p1834_p7, %p1828_p4 }
 0x344   :  { %v1740_v48 = vpop.eup %1739  ;;  %v1121_v13 = vpop.xlane.xlu1 %1120  ;;  %v1258_v35 = vmul.f32 %v2258_v52, %v1224_v57  ;;  %vm1241_vm1 = vcmp.ge.f32.partialorder %v1224_v57, 0.0 }
 0x345   :  { %v1179_v15 = vmul.f32 %v1740_v48, %v2163_v25  ;;  %v1155_v14 = vadd.f32 1e-05, %v1139_v7  ;;  %v1140_v23 = vmul.f32 0.03125, %v1121_v13  ;;  %1753 = vrsqrt.f32 %v1152_v12 }
 0x346   :  { %v1742_v16 = vpop.eup %1741  ;;  %v1115_v19 = vpop.xlane.xlu0 %1114  ;;  %v1222_v20 = vadd.f32 %v2254_v6, %v1199_v34 }
 0x347   :  { %v1202_v21 = vmul.f32 %v2247_v55, %v1179_v15  ;;  %v1182_v27 = vmul.f32 %v1742_v16, %v2172_v30  ;;  %1755 = vrsqrt.f32 %v1155_v14  ;;  %v1156_v59 = vadd.f32 1e-05, %v1140_v23 }
 0x348   :  { %v1744_v44 = vpop.eup %1743  ;;  %v1137_v29 = vmul.f32 0.03125, %v1115_v19  ;;  %v1125_v25 = vpop.xlane.xlu1 %1124  ;;  %v1256_v30 = vmul.f32 %v2258_v52, %v1222_v20  ;;  %vm1239_vm3 = vcmp.ge.f32.partialorder %v1222_v20, 0.0 }
 0x349   :  { %v1225_v38 = vadd.f32 %v2254_v6, %v1202_v21  ;;  %v1205_v31 = vmul.f32 %v2247_v55, %v1182_v27  ;;  %v1177_v46 = vmul.f32 %v1744_v44, %v2166_v28  ;;  %v1142_v33 = vmul.f32 0.03125, %v1125_v25 }
 0x34a   :  { %v1746_v0 = vpop.eup %1745  ;;  %1757 = vrsqrt.f32 %v1156_v59  ;;  %v1153_v22 = vadd.f32 1e-05, %v1137_v29  ;;  %v1123_v60 = vpop.xlane.xlu0 %1122 }
 0x34b   :  { %v1259_v37 = vmul.f32 %v2258_v52, %v1225_v38  ;;  %v1200_v39 = vmul.f32 %v2247_v55, %v1177_v46  ;;  %v1180_v58 = vmul.f32 %v1746_v0, %v2184_v40  ;;  %v1158_v42 = vadd.f32 1e-05, %v1142_v33 }
 0x34c   :  { %v1748_v41 = vpop.eup %1747  ;;  %1759 = vrsqrt.f32 %v1153_v22  ;;  %v1141_v28 = vmul.f32 0.03125, %v1123_v60  ;;  %vm1242_vm2 = vcmp.ge.f32.partialorder %v1225_v38, 0.0  ;;  %v1228_v43 = vadd.f32 %v2254_v6, %v1205_v31 }
 0x34d   :  { %v1223_v45 = vadd.f32 %v2254_v6, %v1200_v39  ;;  %v1183_v3 = vmul.f32 %v1748_v41, %v2178_v36  ;;  %v1203_v49 = vmul.f32 %v2247_v55, %v1180_v58  ;;  %1761 = vrsqrt.f32 %v1158_v42 }
 0x34e   :  { %v1750_v47 = vpop.eup %1749  ;;  %v1157_v10 = vadd.f32 1e-05, %v1141_v28  ;;  %v1127_v53 = vpop.xlane.xlu0 %1126  ;;  %v1274_v40 = vsel %vm1241_vm1, %v1224_v57, %v1258_v35  ;;  %v1275_v61 = vsel %vm1242_vm2, %v1225_v38, %v1259_v37  ;;  %v1272_v36 = vsel %vm1239_vm3, %v1222_v20, %v1256_v30 }
 0x34f   :  { %v1257_v54 = vmul.f32 %v2258_v52, %v1223_v45  ;;  %v1206_v56 = vmul.f32 %v2247_v55, %v1183_v3  ;;  %v1186_v26 = vmul.f32 %v1750_v47, %v2193_v50  ;;  %v1143_v24 = vmul.f32 0.03125, %v1127_v53 }
 0x350   :  { %v1752_v62 = vpop.eup %1751  ;;  %1763 = vrsqrt.f32 %v1157_v10  ;;  %vm1240_vm4 = vcmp.ge.f32.partialorder %v1223_v45, 0.0  ;;  %v1262_v1 = vmul.f32 %v2258_v52, %v1228_v43  ;;  %v1226_v34 = vadd.f32 %v2254_v6, %v1203_v49 }
 0x351   :  { %v1229_v2 = vadd.f32 %v2254_v6, %v1206_v56  ;;  %v1209_v4 = vmul.f32 %v2247_v55, %v1186_v26  ;;  %v1181_v5 = vmul.f32 %v1752_v62, %v2196_v51  ;;  %v1159_v7 = vadd.f32 1e-05, %v1143_v24 }
 0x352   :  { %v1273_v48 = vsel %vm1240_vm4, %v1223_v45, %v1257_v54  ;;  %v1486_v12 = vpack.c.bf16 %v1275_v61, %v1274_v40  ;;  %v1754_v50 = vpop.eup %1753  ;;  %vm1245_vm5 = vcmp.ge.f32.partialorder %v1228_v43, 0.0  ;;  %v1260_v20 = vmul.f32 %v2258_v52, %v1226_v34 }
 0x353   :  { %v1263_v13 = vmul.f32 %v2258_v52, %v1229_v2  ;;  %v1204_v15 = vmul.f32 %v2247_v55, %v1181_v5  ;;  %vm1246_vm6 = vcmp.ge.f32.partialorder %v1229_v2, 0.0  ;;  %v1184_v23 = vmul.f32 %v1754_v50, %v2208_v63 }
 0x354   :  { %v1756_v14 = vpop.eup %1755  ;;  %1765 = vrsqrt.f32 %v1159_v7  ;;  %v1481_v16 = vpack.c.bf16 %v1273_v48, %v1272_v36  ;;  %1518 = vst [vmem:[#allocation13 + $0x8] sm:$0xff] %v1486_v12   ;;  %v1232_v51 = vadd.f32 %v2254_v6, %v1209_v4  ;;  %v1278_v21 = vsel %vm1245_vm5, %v1228_v43, %v1262_v1 }
 0x355   :  { %v1227_v57 = vadd.f32 %v2254_v6, %v1204_v15  ;;  %v1187_v19 = vmul.f32 %v1756_v14, %v2202_v11  ;;  %v1279_v27 = vsel %vm1246_vm6, %v1229_v2, %v1263_v13  ;;  %vm1243_vm7 = vcmp.ge.f32.partialorder %v1226_v34, 0.0 }
 0x356   :  { %1482 = vst [vmem:[#allocation13] sm:$0xff] %v1481_v16   ;;  %v1207_v63 = vmul.f32 %v2247_v55, %v1184_v23  ;;  %v1496_v38 = vpack.c.bf16 %v1279_v27, %v1278_v21  ;;  %v1266_v11 = vmul.f32 %v2258_v52, %v1232_v51  ;;  %vm1249_vm9 = vcmp.ge.f32.partialorder %v1232_v51, 0.0 }
 0x357   :  { %v1758_v44 = vpop.eup %1757  ;;  %v1261_v59 = vmul.f32 %v2258_v52, %v1227_v57  ;;  %v1210_v29 = vmul.f32 %v2247_v55, %v1187_v19  ;;  %vm1244_vm8 = vcmp.ge.f32.partialorder %v1227_v57, 0.0  ;;  %v1276_v22 = vsel %vm1243_vm7, %v1226_v34, %v1260_v20 }
 0x358   :  { %v1188_v25 = vmul.f32 %v1758_v44, %v2216_v8  ;;  %1520 = vst [vmem:[#allocation13 + $0x18] sm:$0xff] %v1496_v38   ;;  %v1230_v8 = vadd.f32 %v2254_v6, %v1207_v63  ;;  %v1282_v42 = vsel %vm1249_vm9, %v1232_v51, %v1266_v11 }
 0x359   :  { %v1760_v31 = vpop.eup %1759  ;;  %v1233_v46 = vadd.f32 %v2254_v6, %v1210_v29  ;;  %v1277_v33 = vsel %vm1244_vm8, %v1227_v57, %v1261_v59 }
 0x35a   :  { %v1211_v0 = vmul.f32 %v2247_v55, %v1188_v25  ;;  %v1185_v35 = vmul.f32 %v1760_v31, %v2219_v9  ;;  %v1762_v60 = vpop.eup %1761  ;;  %v1491_v37 = vpack.c.bf16 %v1277_v33, %v1276_v22  ;;  %v1264_v49 = vmul.f32 %v2258_v52, %v1230_v8 }
 0x35b   :  { %v1267_v30 = vmul.f32 %v2258_v52, %v1233_v46  ;;  %vm1250_vm10 = vcmp.ge.f32.partialorder %v1233_v46, 0.0  ;;  %v1190_v58 = vmul.f32 %v1762_v60, %v2228_v17  ;;  %vm1247_vm12 = vcmp.ge.f32.partialorder %v1230_v8, 0.0 }
 0x35c   :  { %v1208_v39 = vmul.f32 %v2247_v55, %v1185_v35  ;;  %1519 = vst [vmem:[#allocation13 + $0x10] sm:$0xff] %v1491_v37   ;;  %v1234_v9 = vadd.f32 %v2254_v6, %v1211_v0  ;;  %v1280_v24 = vsel %vm1247_vm12, %v1230_v8, %v1264_v49 }
 0x35d   :  { %v1764_v41 = vpop.eup %1763  ;;  %v1283_v28 = vsel %vm1250_vm10, %v1233_v46, %v1267_v30  ;;  %v1213_v45 = vmul.f32 %v2247_v55, %v1190_v58 }
 0x35e   :  { %v1231_v43 = vadd.f32 %v2254_v6, %v1208_v39  ;;  %v1189_v3 = vmul.f32 %v1764_v41, %v2231_v18  ;;  %v1506_v47 = vpack.c.bf16 %v1283_v28, %v1282_v42  ;;  %v1268_v40 = vmul.f32 %v2258_v52, %v1234_v9 }
 0x35f   :  { %v1236_v54 = vadd.f32 %v2254_v6, %v1213_v45  ;;  %vm1251_vm13 = vcmp.ge.f32.partialorder %v1234_v9, 0.0 }
 0x360   :  { %v1265_v10 = vmul.f32 %v2258_v52, %v1231_v43  ;;  %v1212_v53 = vmul.f32 %v2247_v55, %v1189_v3  ;;  %vm1248_vm11 = vcmp.ge.f32.partialorder %v1231_v43, 0.0  ;;  %1522 = vst [vmem:[#allocation13 + $0x28] sm:$0xff] %v1506_v47   ;;  %v1284_v4 = vsel %vm1251_vm13, %v1234_v9, %v1268_v40 }
 0x361   :  { %v1766_v17 = vpop.eup %1765  ;;  %v1270_v1 = vmul.f32 %v2258_v52, %v1236_v54  ;;  %vm1253_vm15 = vcmp.ge.f32.partialorder %v1236_v54, 0.0 }
 0x362   :  { %v1235_v56 = vadd.f32 %v2254_v6, %v1212_v53  ;;  %v1191_v26 = vmul.f32 %v1766_v17, %v2239_v32  ;;  %v1281_v18 = vsel %vm1248_vm11, %v1231_v43, %v1265_v10 }
 0x363   :  { %v1501_v36 = vpack.c.bf16 %v1281_v18, %v1280_v24  ;;  %v1286_v7 = vsel %vm1253_vm15, %v1236_v54, %v1270_v1 }
 0x364   :  { %v1269_v61 = vmul.f32 %v2258_v52, %v1235_v56  ;;  %v1214_v62 = vmul.f32 %v2247_v55, %v1191_v26  ;;  %vm1252_vm14 = vcmp.ge.f32.partialorder %v1235_v56, 0.0 }
 0x365   :  { %1521 = vst [vmem:[#allocation13 + $0x20] sm:$0xff] %v1501_v36  }
 0x366   :  { %v1237_v2 = vadd.f32 %v2254_v6, %v1214_v62  ;;  %v1285_v5 = vsel %vm1252_vm14, %v1235_v56, %v1269_v61 }
 0x367   :  { %v1511_v34 = vpack.c.bf16 %v1285_v5, %v1284_v4 }
 0x368   :  { %vm1254_vm0 = vcmp.ge.f32.partialorder %v1237_v2, 0.0  ;;  %v1271_v32 = vmul.f32 %v2258_v52, %v1237_v2 }
 0x369   :  { %1523 = vst [vmem:[#allocation13 + $0x30] sm:$0xff] %v1511_v34  }
 0x36a   :  { %v1287_v55 = vsel %vm1254_vm0, %v1237_v2, %v1271_v32 }
 0x36b   :  { %v1516_v48 = vpack.c.bf16 %v1287_v55, %v1286_v7 }
 0x36d   :  { %1524 = vst [vmem:[#allocation13 + $0x38] sm:$0xff] %v1516_v48  }
 0x36e   :  { %1838 = shalt.err (!%p1835_p8)
}
 0x36f   :  { %1379 = dma.vmem_to_hbm [thread:$0]  %s1374_s11, 1024, %s2338_s12, [#allocation9], %s1855_s28, %s1855_s28, %s1856_s29  }
 0x370   :  { %1851 = dma.done.wait [#allocation9], 1024  }
 0x371   :  { %1852 = vsyncadd [#allocation9], 4294966272 }
 0x372   :  { %1383 = vsyncpa [#allocation8], 1 }
 0x373   :  { %1384 = vsyncpa [#allocation11], 1 }
 0x374   :  { %1385 = vsyncpa [#allocation9], 1 }

</bundles_post_ra>
